<compile_context>
chip_gen: v6e
topology: v6e:2x2x1
jax: 0.10.0
libtpu: 0.0.40
codegen_flags: <defaults>
</compile_context>

<pallas_src>
import functools

import numpy as np
import jax
import jax.numpy as jnp
from jax.experimental import pallas as pl
from jax.experimental.pallas import tpu as pltpu


def _round_up(x, m):
    return (x + m - 1) // m * m


def _nca_fused_kernel(shifts, inner_steps, x0_hbm, mask_ref, wp_ref, bp_ref,
                      w2_ref, b2_ref, out_ref, state_ref, patches_ref):
    """`inner_steps` NCA steps per grid iteration; state resident in VMEM.

    x0_hbm     : (B, Cp, N) f32, memory_space=ANY — read once per image
    mask_ref   : (1, N)  f32   1.0 on real pixels, 0.0 on halo/alignment pad
    wp_ref     : (Hd, 9*Cp) bf16   fused (w1 @ perception) weights
    bp_ref     : (Hd, 1) f32       fused bias (w1 @ bp + b1)
    w2_ref     : (Cp, Hd) bf16, b2_ref: (Cp, 1) f32   second 1x1 conv
    out_ref    : (1, inner_steps, Cp, N) f32   this block's new states
    state_ref  : (Cp, N) f32   VMEM-resident state (scratch)
    patches_ref: (9*Cp, N) bf16 im2col scratch
    """
    b = pl.program_id(0)
    s = pl.program_id(1)
    Cp = state_ref.shape[0]

    @pl.when(s == 0)
    def _():
        # Load this image's initial state straight from HBM into the scratch.
        pltpu.sync_copy(x0_hbm.at[b], state_ref)

    # Hoist invariant loads out of the (static) inner-step loop.
    wp = wp_ref[...]
    bp = bp_ref[...]
    w2 = w2_ref[...]
    b2 = b2_ref[...]
    mask = mask_ref[...]

    for i in range(inner_steps):
        state = state_ref[...]                                   # (Cp, N) f32

        # im2col by lane rolls of the flat padded state (XLU slot), written
        # straight into the bf16 patches scratch (no concat / extra copy).
        for t, sh in enumerate(shifts):
            tap = state if sh == 0 else pltpu.roll(state, shift=sh, axis=1)
            patches_ref[t * Cp:(t + 1) * Cp, :] = tap.astype(jnp.bfloat16)

        # Fused perception(3x3) + first 1x1 conv == one K = 9*Cp matmul.
        h = jnp.dot(wp, patches_ref[...],
                    preferred_element_type=jnp.float32)          # (Hd, N)
        h = jnp.maximum(h + bp, 0.0)                             # ReLU

        # Second 1x1 conv -> Tanh.
        delta = jnp.dot(w2, h.astype(jnp.bfloat16),
                        preferred_element_type=jnp.float32)      # (Cp, N)
        delta = jnp.tanh(delta + b2)

        # Residual update; re-zero halo/alignment padding so it never leaks.
        new_state = (state + delta) * mask
        state_ref[...] = new_state
        out_ref[0, i] = new_state


def _stage_params(params, C, Cp, Hd):
    """PyTorch-layout params -> fused, channel-padded, lane-dense layout."""
    # (Hd, C, 3, 3) -> (Hd, ky, kx, Cp) -> (Hd, 9*Cp); column = tap*Cp + c.
    wp = jnp.transpose(params["wp"], (0, 2, 3, 1))
    wp = jnp.pad(wp, ((0, 0), (0, 0), (0, 0), (0, Cp - C)))
    wp = wp.reshape(Hd, 9 * Cp)

    w1 = params["w1"][:, :, 0, 0]                                  # (Hd, Hd)
    # Fold the first 1x1 conv into the perception conv (done once, f32).
    hi = jax.lax.Precision.HIGHEST
    wp_fused = jnp.dot(w1, wp, precision=hi)                       # (Hd, 9*Cp)
    bp_fused = jnp.dot(w1, params["bp"], precision=hi) + params["b1"]

    w2 = jnp.pad(params["w2"][:, :, 0, 0], ((0, Cp - C), (0, 0)))  # (Cp, Hd)
    b2 = jnp.pad(params["b2"], (0, Cp - C)).reshape(Cp, 1)

    return {
        "wp": wp_fused.astype(jnp.bfloat16),
        "bp": bp_fused.reshape(Hd, 1).astype(jnp.float32),
        "w2": w2.astype(jnp.bfloat16),
        "b2": b2.astype(jnp.float32),
    }


def _pick_inner_steps(steps, Cp, N):
    """Largest divisor of `steps` (<=8) whose out block fits a small budget."""
    budget = 2 * 1024 * 1024                      # bytes for one output block
    max_by_vmem = max(1, budget // (Cp * N * 4))
    cap = int(min(8, steps, max_by_vmem))
    for d in range(cap, 0, -1):
        if steps % d == 0:
            return d
    return 1


def nca_forward(x_nchw, params, steps=50):
    """Mirrors NCA.forward: returns a list of steps+1 NCHW float32 states."""
    x_nchw = x_nchw.astype(jnp.float32)
    B, C, H, W = x_nchw.shape
    Hd = params["w1"].shape[0]
    Cp = _round_up(C, 8)
    Hp, Wp = H + 2, W + 2
    n_img = Hp * Wp
    N = _round_up(n_img, 128)                 # lane-dense per-image pixel axis

    inner_steps = _pick_inner_steps(steps, Cp, N)
    steps_outer = steps // inner_steps

    kp = _stage_params(params, C, Cp, Hd)

    # Initial state -> (B, Cp, N): channel-major, flat zero-padded images.
    xpad = jnp.pad(x_nchw, ((0, 0), (0, Cp - C), (1, 1), (1, 1)))
    x0 = xpad.reshape(B, Cp, n_img)
    x0 = jnp.pad(x0, ((0, 0), (0, 0), (0, N - n_img)))

    # Interior mask (real pixels = 1, halo ring + alignment tail = 0).
    m = np.zeros((Hp, Wp), np.float32)
    m[1:H + 1, 1:W + 1] = 1.0
    mask_np = np.zeros((1, N), np.float32)
    mask_np[0, :n_img] = m.reshape(-1)
    mask = jnp.asarray(mask_np)

    # Tap shifts in the per-image flat padded index space (jnp.roll-style).
    shifts = tuple((-((ky - 1) * Wp + (kx - 1))) % N
                   for ky in range(3) for kx in range(3))

    # Explicit scoped-VMEM sizing (state + patches + double-buffered out/mask
    # blocks + headroom for the (Hd, N) intermediate), clamped to 64 MiB so it
    # is valid on v7x too.
    est = (Cp * N * 4 + 9 * Cp * N * 2
           + 2 * inner_steps * Cp * N * 4 + 2 * N * 4 + 4 * Hd * N * 4)
    vmem_limit = int(min(64 * 2 ** 20, max(16 * 2 ** 20, 2 * est)))

    out = pl.pallas_call(
        functools.partial(_nca_fused_kernel, shifts, inner_steps),
        out_shape=jax.ShapeDtypeStruct((B, steps, Cp, N), jnp.float32),
        grid=(B, steps_outer),
        in_specs=[
            pl.BlockSpec(memory_space=pl.ANY),                  # x0 (HBM)
            pl.BlockSpec((1, N), lambda b, s: (0, 0)),          # mask
            pl.BlockSpec((Hd, 9 * Cp), lambda b, s: (0, 0)),    # wp fused bf16
            pl.BlockSpec((Hd, 1), lambda b, s: (0, 0)),         # bp fused
            pl.BlockSpec((Cp, Hd), lambda b, s: (0, 0)),        # w2 bf16
            pl.BlockSpec((Cp, 1), lambda b, s: (0, 0)),         # b2
        ],
        out_specs=pl.BlockSpec((1, inner_steps, Cp, N),
                               lambda b, s: (b, s, 0, 0)),
        scratch_shapes=[
            pltpu.VMEM((Cp, N), jnp.float32),                   # state
            pltpu.VMEM((9 * Cp, N), jnp.bfloat16),              # patches
        ],
        compiler_params=pltpu.CompilerParams(
            dimension_semantics=("parallel", "arbitrary"),
            vmem_limit_bytes=vmem_limit),
    )(x0, mask, kp["wp"], kp["bp"], kp["w2"], kp["b2"])

    # Unpack on the XLA side: (B, steps, Cp, N) -> steps x (B, C, H, W).
    seq = out[:, :, :C, :n_img].reshape(B, steps, C, Hp, Wp)
    seq = seq[:, :, :, 1:H + 1, 1:W + 1]
    return [x_nchw] + [seq[:, i] for i in range(steps)]


def init_params(key, n_channels, hidden_size):
    """PyTorch-Conv2d-style uniform init, PyTorch weight layouts."""
    ks = jax.random.split(key, 6)

    def u(k, shape, fan_in):
        bound = 1.0 / np.sqrt(float(fan_in))
        return jax.random.uniform(k, shape, jnp.float32, -bound, bound)

    C, Hd = n_channels, hidden_size
    return {
        "wp": u(ks[0], (Hd, C, 3, 3), C * 9),
        "bp": u(ks[1], (Hd,), C * 9),
        "w1": u(ks[2], (Hd, Hd, 1, 1), Hd),
        "b1": u(ks[3], (Hd,), Hd),
        "w2": u(ks[4], (C, Hd, 1, 1), Hd),
        "b2": u(ks[5], (C,), Hd),
    }


def create_seed(n_channels, batch_size=1, size=64):
    """Mirrors NCA.create_seed."""
    seed = jnp.zeros((batch_size, n_channels, size, size), jnp.float32)
    k = min(4, n_channels)
    return seed.at[:, :k, size // 2, size // 2].set(1.0)


def _nca_reference(x_nchw, params, steps):
    """Pure-JAX (non-Pallas) reference of the PyTorch module."""
    wp, bp = params["wp"], params["bp"]
    w1, b1 = params["w1"][:, :, 0, 0], params["b1"]
    w2, b2 = params["w2"][:, :, 0, 0], params["b2"]
    B, C, H, W = x_nchw.shape
    states = [x_nchw]
    x = x_nchw
    for _ in range(steps):
        xp = jnp.pad(x, ((0, 0), (0, 0), (1, 1), (1, 1)))
        dx = jnp.broadcast_to(bp[None, :, None, None],
                              (B, wp.shape[0], H, W))
        for ky in range(3):
            for kx in range(3):
                patch = xp[:, :, ky:ky + H, kx:kx + W]
                dx = dx + jnp.einsum('bcij,oc->boij', patch, wp[:, :, ky, kx])
        h = jnp.maximum(jnp.einsum('bcij,oc->boij', dx, w1)
                        + b1[None, :, None, None], 0.0)
        delta = jnp.tanh(jnp.einsum('bcij,oc->boij', h, w2)
                         + b2[None, :, None, None])
        x = x + delta
        states.append(x)
    return states


if __name__ == "__main__":
    n_channels, hidden_size = 4, 32
    batch, size, steps = 2, 16, 5

    key = jax.random.PRNGKey(0)
    pkey, xkey = jax.random.split(key)
    params = init_params(pkey, n_channels, hidden_size)

    # Deterministic example input (NCHW, like the PyTorch module expects).
    x = jax.random.normal(xkey, (batch, n_channels, size, size), jnp.float32)

    states = nca_forward(x, params, steps=steps)
    jax.block_until_ready(states[-1])

    assert len(states) == steps + 1
    assert states[-1].shape == (batch, n_channels, size, size)
    assert bool(jnp.all(jnp.isfinite(states[-1])))

    # Numerical sanity check vs pure-JAX reference (tolerance covers bf16
    # MXU operands with f32 accumulation over `steps` residual updates).
    ref = _nca_reference(x, params, steps)
    err = float(jnp.max(jnp.abs(states[-1] - ref[-1])))
    assert err < 0.2, f"max abs err vs reference: {err}"

    print("KERNEL_OK")
</pallas_src>

<mosaic_0001>
module attributes {stable_mosaic.version = 11 : i64} {
  func.func @_nca_fused_kernel(%arg0: i32, %arg1: i32, %arg2: memref<2x8x384xf32, #tpu.memory_space<any>>, %arg3: memref<1x384xf32, #tpu.memory_space<vmem>>, %arg4: memref<32x72xbf16, #tpu.memory_space<vmem>>, %arg5: memref<32x1xf32, #tpu.memory_space<vmem>>, %arg6: memref<8x32xbf16, #tpu.memory_space<vmem>>, %arg7: memref<8x1xf32, #tpu.memory_space<vmem>>, %arg8: memref<1x5x8x384xf32, #tpu.memory_space<vmem>>, %arg9: memref<8x384xf32, #tpu.memory_space<vmem>>, %arg10: memref<72x384xbf16, #tpu.memory_space<vmem>>) attributes {dimension_semantics = [#tpu.dimension_semantics<parallel>, #tpu.dimension_semantics<arbitrary>], iteration_bounds = array<i64: 2, 1>, scalar_prefetch = 0 : i64, scratch_operands = 2 : i64, tpu.core_type = #tpu.core_type<tc>, window_params = [{}, {pipeline_mode = #tpu.pipeline_mode<synchronous>, transform_indices = @transform_1, window_bounds = array<i64: 1, 384>}, {pipeline_mode = #tpu.pipeline_mode<synchronous>, transform_indices = @transform_2, window_bounds = array<i64: 32, 72>}, {pipeline_mode = #tpu.pipeline_mode<synchronous>, transform_indices = @transform_3, window_bounds = array<i64: 32, 1>}, {pipeline_mode = #tpu.pipeline_mode<synchronous>, transform_indices = @transform_4, window_bounds = array<i64: 8, 32>}, {pipeline_mode = #tpu.pipeline_mode<synchronous>, transform_indices = @transform_5, window_bounds = array<i64: 8, 1>}, {transform_indices = @transform_6, window_bounds = array<i64: 1, 5, 8, 384>}]} {
    %c0_i32 = arith.constant 0 : i32
    %0 = arith.cmpi eq, %arg1, %c0_i32 : i32
    %1 = arith.extui %0 : i1 to i32
    %c0_i32_0 = arith.constant 0 : i32
    %2 = arith.cmpi ne, %1, %c0_i32_0 : i32
    scf.if %2 {
      "tpu.region"() ({
        %233 = tpu.sem_alloc : memref<!tpu.dma_semaphore, #tpu.memory_space<semaphore_mem>>
        %c0_i32_184 = arith.constant 0 : i32
        %c0_i32_185 = arith.constant 0 : i32
        %234 = tpu.memref_slice %arg2[%arg0, %c0_i32_184, %c0_i32_185] : memref<2x8x384xf32, #tpu.memory_space<any>> -> memref<1x8x384xf32, #tpu.memory_space<any>>
        %235 = tpu.memref_squeeze %234 : memref<1x8x384xf32, #tpu.memory_space<any>> -> memref<8x384xf32, #tpu.memory_space<any>>
        tpu.enqueue_dma source(%235 : memref<8x384xf32, #tpu.memory_space<any>>) target(%arg9 : memref<8x384xf32, #tpu.memory_space<vmem>>) target_semaphore(%233 : memref<!tpu.dma_semaphore, #tpu.memory_space<semaphore_mem>>)
        %c0_i32_186 = arith.constant 0 : i32
        %c0_i32_187 = arith.constant 0 : i32
        %236 = tpu.memref_slice %arg2[%arg0, %c0_i32_186, %c0_i32_187] : memref<2x8x384xf32, #tpu.memory_space<any>> -> memref<1x8x384xf32, #tpu.memory_space<any>>
        %237 = tpu.memref_squeeze %236 : memref<1x8x384xf32, #tpu.memory_space<any>> -> memref<8x384xf32, #tpu.memory_space<any>>
        tpu.wait_dma2 semaphore(%233 : memref<!tpu.dma_semaphore, #tpu.memory_space<semaphore_mem>>) src(%237 : memref<8x384xf32, #tpu.memory_space<any>>) dst(%arg9 : memref<8x384xf32, #tpu.memory_space<vmem>>)
        tpu.yield
      }) : () -> ()
    } else {
    }
    %c0 = arith.constant 0 : index
    %c0_1 = arith.constant 0 : index
    %3 = vector.load %arg4[%c0, %c0_1] : memref<32x72xbf16, #tpu.memory_space<vmem>>, vector<32x72xbf16>
    %c0_2 = arith.constant 0 : index
    %c0_3 = arith.constant 0 : index
    %4 = vector.load %arg5[%c0_2, %c0_3] : memref<32x1xf32, #tpu.memory_space<vmem>>, vector<32x1xf32>
    %c0_4 = arith.constant 0 : index
    %c0_5 = arith.constant 0 : index
    %5 = vector.load %arg6[%c0_4, %c0_5] : memref<8x32xbf16, #tpu.memory_space<vmem>>, vector<8x32xbf16>
    %c0_6 = arith.constant 0 : index
    %c0_7 = arith.constant 0 : index
    %6 = vector.load %arg7[%c0_6, %c0_7] : memref<8x1xf32, #tpu.memory_space<vmem>>, vector<8x1xf32>
    %c0_8 = arith.constant 0 : index
    %c0_9 = arith.constant 0 : index
    %7 = vector.load %arg3[%c0_8, %c0_9] : memref<1x384xf32, #tpu.memory_space<vmem>>, vector<1x384xf32>
    %c0_10 = arith.constant 0 : index
    %c0_11 = arith.constant 0 : index
    %8 = vector.load %arg9[%c0_10, %c0_11] : memref<8x384xf32, #tpu.memory_space<vmem>>, vector<8x384xf32>
    %c19_i32 = arith.constant 19 : i32
    %9 = tpu.dynamic_rotate %8 by %c19_i32 dim 1 : vector<8x384xf32>, i32 -> vector<8x384xf32>
    %10 = arith.truncf %9 : vector<8x384xf32> to vector<8x384xbf16>
    %c0_12 = arith.constant 0 : index
    %c0_13 = arith.constant 0 : index
    %11 = vector.load %arg10[%c0_12, %c0_13] : memref<72x384xbf16, #tpu.memory_space<vmem>>, vector<8x384xbf16>
    tpu.vector_store %arg10[%c0_12, %c0_13], %10 {strides = array<i32>} : memref<72x384xbf16, #tpu.memory_space<vmem>>, vector<8x384xbf16>,
    %c18_i32 = arith.constant 18 : i32
    %12 = tpu.dynamic_rotate %8 by %c18_i32 dim 1 : vector<8x384xf32>, i32 -> vector<8x384xf32>
    %13 = arith.truncf %12 : vector<8x384xf32> to vector<8x384xbf16>
    %c8 = arith.constant 8 : index
    %c0_14 = arith.constant 0 : index
    %14 = vector.load %arg10[%c8, %c0_14] : memref<72x384xbf16, #tpu.memory_space<vmem>>, vector<8x384xbf16>
    tpu.vector_store %arg10[%c8, %c0_14], %13 {strides = array<i32>} : memref<72x384xbf16, #tpu.memory_space<vmem>>, vector<8x384xbf16>,
    %c17_i32 = arith.constant 17 : i32
    %15 = tpu.dynamic_rotate %8 by %c17_i32 dim 1 : vector<8x384xf32>, i32 -> vector<8x384xf32>
    %16 = arith.truncf %15 : vector<8x384xf32> to vector<8x384xbf16>
    %c16 = arith.constant 16 : index
    %c0_15 = arith.constant 0 : index
    %17 = vector.load %arg10[%c16, %c0_15] : memref<72x384xbf16, #tpu.memory_space<vmem>>, vector<8x384xbf16>
    tpu.vector_store %arg10[%c16, %c0_15], %16 {strides = array<i32>} : memref<72x384xbf16, #tpu.memory_space<vmem>>, vector<8x384xbf16>,
    %c1_i32 = arith.constant 1 : i32
    %18 = tpu.dynamic_rotate %8 by %c1_i32 dim 1 : vector<8x384xf32>, i32 -> vector<8x384xf32>
    %19 = arith.truncf %18 : vector<8x384xf32> to vector<8x384xbf16>
    %c24 = arith.constant 24 : index
    %c0_16 = arith.constant 0 : index
    %20 = vector.load %arg10[%c24, %c0_16] : memref<72x384xbf16, #tpu.memory_space<vmem>>, vector<8x384xbf16>
    tpu.vector_store %arg10[%c24, %c0_16], %19 {strides = array<i32>} : memref<72x384xbf16, #tpu.memory_space<vmem>>, vector<8x384xbf16>,
    %21 = arith.truncf %8 : vector<8x384xf32> to vector<8x384xbf16>
    %c32 = arith.constant 32 : index
    %c0_17 = arith.constant 0 : index
    %22 = vector.load %arg10[%c32, %c0_17] : memref<72x384xbf16, #tpu.memory_space<vmem>>, vector<8x384xbf16>
    tpu.vector_store %arg10[%c32, %c0_17], %21 {strides = array<i32>} : memref<72x384xbf16, #tpu.memory_space<vmem>>, vector<8x384xbf16>,
    %c383_i32 = arith.constant 383 : i32
    %23 = tpu.dynamic_rotate %8 by %c383_i32 dim 1 : vector<8x384xf32>, i32 -> vector<8x384xf32>
    %24 = arith.truncf %23 : vector<8x384xf32> to vector<8x384xbf16>
    %c40 = arith.constant 40 : index
    %c0_18 = arith.constant 0 : index
    %25 = vector.load %arg10[%c40, %c0_18] : memref<72x384xbf16, #tpu.memory_space<vmem>>, vector<8x384xbf16>
    tpu.vector_store %arg10[%c40, %c0_18], %24 {strides = array<i32>} : memref<72x384xbf16, #tpu.memory_space<vmem>>, vector<8x384xbf16>,
    %c367_i32 = arith.constant 367 : i32
    %26 = tpu.dynamic_rotate %8 by %c367_i32 dim 1 : vector<8x384xf32>, i32 -> vector<8x384xf32>
    %27 = arith.truncf %26 : vector<8x384xf32> to vector<8x384xbf16>
    %c48 = arith.constant 48 : index
    %c0_19 = arith.constant 0 : index
    %28 = vector.load %arg10[%c48, %c0_19] : memref<72x384xbf16, #tpu.memory_space<vmem>>, vector<8x384xbf16>
    tpu.vector_store %arg10[%c48, %c0_19], %27 {strides = array<i32>} : memref<72x384xbf16, #tpu.memory_space<vmem>>, vector<8x384xbf16>,
    %c366_i32 = arith.constant 366 : i32
    %29 = tpu.dynamic_rotate %8 by %c366_i32 dim 1 : vector<8x384xf32>, i32 -> vector<8x384xf32>
    %30 = arith.truncf %29 : vector<8x384xf32> to vector<8x384xbf16>
    %c56 = arith.constant 56 : index
    %c0_20 = arith.constant 0 : index
    %31 = vector.load %arg10[%c56, %c0_20] : memref<72x384xbf16, #tpu.memory_space<vmem>>, vector<8x384xbf16>
    tpu.vector_store %arg10[%c56, %c0_20], %30 {strides = array<i32>} : memref<72x384xbf16, #tpu.memory_space<vmem>>, vector<8x384xbf16>,
    %c365_i32 = arith.constant 365 : i32
    %32 = tpu.dynamic_rotate %8 by %c365_i32 dim 1 : vector<8x384xf32>, i32 -> vector<8x384xf32>
    %33 = arith.truncf %32 : vector<8x384xf32> to vector<8x384xbf16>
    %c64 = arith.constant 64 : index
    %c0_21 = arith.constant 0 : index
    %34 = vector.load %arg10[%c64, %c0_21] : memref<72x384xbf16, #tpu.memory_space<vmem>>, vector<8x384xbf16>
    tpu.vector_store %arg10[%c64, %c0_21], %33 {strides = array<i32>} : memref<72x384xbf16, #tpu.memory_space<vmem>>, vector<8x384xbf16>,
    %c0_22 = arith.constant 0 : index
    %c0_23 = arith.constant 0 : index
    %35 = vector.load %arg10[%c0_22, %c0_23] : memref<72x384xbf16, #tpu.memory_space<vmem>>, vector<72x384xbf16>
    %cst = arith.constant dense<0.000000e+00> : vector<32x384xf32>
    %36 = tpu.matmul %3, %35, %cst {dimension_numbers = #tpu.dot_dimension_numbers<[1], [0], [0], [1], [0, 0, 1, 1], [], []>} : vector<32x72xbf16>, vector<72x384xbf16>, vector<32x384xf32> -> vector<32x384xf32>
    %37 = vector.broadcast %4 : vector<32x1xf32> to vector<32x384xf32>
    %38 = arith.addf %36, %37 : vector<32x384xf32>
    %cst_24 = arith.constant 0.000000e+00 : f32
    %39 = vector.broadcast %cst_24 : f32 to vector<32x384xf32>
    %40 = arith.maximumf %38, %39 : vector<32x384xf32>
    %41 = arith.truncf %40 : vector<32x384xf32> to vector<32x384xbf16>
    %cst_25 = arith.constant dense<0.000000e+00> : vector<8x384xf32>
    %42 = tpu.matmul %5, %41, %cst_25 {dimension_numbers = #tpu.dot_dimension_numbers<[1], [0], [0], [1], [0, 0, 1, 1], [], []>} : vector<8x32xbf16>, vector<32x384xbf16>, vector<8x384xf32> -> vector<8x384xf32>
    %43 = vector.broadcast %6 : vector<8x1xf32> to vector<8x384xf32>
    %44 = arith.addf %42, %43 : vector<8x384xf32>
    %45 = math.tanh %44 : vector<8x384xf32>
    %46 = arith.addf %8, %45 : vector<8x384xf32>
    %47 = vector.broadcast %7 : vector<1x384xf32> to vector<8x384xf32>
    %48 = arith.mulf %46, %47 : vector<8x384xf32>
    %c0_26 = arith.constant 0 : index
    %c0_27 = arith.constant 0 : index
    %49 = vector.load %arg9[%c0_26, %c0_27] : memref<8x384xf32, #tpu.memory_space<vmem>>, vector<8x384xf32>
    tpu.vector_store %arg9[%c0_26, %c0_27], %48 {strides = array<i32>} : memref<8x384xf32, #tpu.memory_space<vmem>>, vector<8x384xf32>,
    %c0_28 = arith.constant 0 : index
    %c0_29 = arith.constant 0 : index
    %c0_30 = arith.constant 0 : index
    %c0_31 = arith.constant 0 : index
    %50 = vector.load %arg8[%c0_28, %c0_29, %c0_30, %c0_31] : memref<1x5x8x384xf32, #tpu.memory_space<vmem>>, vector<1x1x8x384xf32>
    %51 = vector.shape_cast %50 : vector<1x1x8x384xf32> to vector<8x384xf32>
    %52 = vector.shape_cast %48 : vector<8x384xf32> to vector<1x1x8x384xf32>
    tpu.vector_store %arg8[%c0_28, %c0_29, %c0_30, %c0_31], %52 {strides = array<i32>} : memref<1x5x8x384xf32, #tpu.memory_space<vmem>>, vector<1x1x8x384xf32>,
    %c0_32 = arith.constant 0 : index
    %c0_33 = arith.constant 0 : index
    %53 = vector.load %arg9[%c0_32, %c0_33] : memref<8x384xf32, #tpu.memory_space<vmem>>, vector<8x384xf32>
    %c19_i32_34 = arith.constant 19 : i32
    %54 = tpu.dynamic_rotate %53 by %c19_i32_34 dim 1 : vector<8x384xf32>, i32 -> vector<8x384xf32>
    %55 = arith.truncf %54 : vector<8x384xf32> to vector<8x384xbf16>
    %c0_35 = arith.constant 0 : index
    %c0_36 = arith.constant 0 : index
    %56 = vector.load %arg10[%c0_35, %c0_36] : memref<72x384xbf16, #tpu.memory_space<vmem>>, vector<8x384xbf16>
    tpu.vector_store %arg10[%c0_35, %c0_36], %55 {strides = array<i32>} : memref<72x384xbf16, #tpu.memory_space<vmem>>, vector<8x384xbf16>,
    %c18_i32_37 = arith.constant 18 : i32
    %57 = tpu.dynamic_rotate %53 by %c18_i32_37 dim 1 : vector<8x384xf32>, i32 -> vector<8x384xf32>
    %58 = arith.truncf %57 : vector<8x384xf32> to vector<8x384xbf16>
    %c8_38 = arith.constant 8 : index
    %c0_39 = arith.constant 0 : index
    %59 = vector.load %arg10[%c8_38, %c0_39] : memref<72x384xbf16, #tpu.memory_space<vmem>>, vector<8x384xbf16>
    tpu.vector_store %arg10[%c8_38, %c0_39], %58 {strides = array<i32>} : memref<72x384xbf16, #tpu.memory_space<vmem>>, vector<8x384xbf16>,
    %c17_i32_40 = arith.constant 17 : i32
    %60 = tpu.dynamic_rotate %53 by %c17_i32_40 dim 1 : vector<8x384xf32>, i32 -> vector<8x384xf32>
    %61 = arith.truncf %60 : vector<8x384xf32> to vector<8x384xbf16>
    %c16_41 = arith.constant 16 : index
    %c0_42 = arith.constant 0 : index
    %62 = vector.load %arg10[%c16_41, %c0_42] : memref<72x384xbf16, #tpu.memory_space<vmem>>, vector<8x384xbf16>
    tpu.vector_store %arg10[%c16_41, %c0_42], %61 {strides = array<i32>} : memref<72x384xbf16, #tpu.memory_space<vmem>>, vector<8x384xbf16>,
    %c1_i32_43 = arith.constant 1 : i32
    %63 = tpu.dynamic_rotate %53 by %c1_i32_43 dim 1 : vector<8x384xf32>, i32 -> vector<8x384xf32>
    %64 = arith.truncf %63 : vector<8x384xf32> to vector<8x384xbf16>
    %c24_44 = arith.constant 24 : index
    %c0_45 = arith.constant 0 : index
    %65 = vector.load %arg10[%c24_44, %c0_45] : memref<72x384xbf16, #tpu.memory_space<vmem>>, vector<8x384xbf16>
    tpu.vector_store %arg10[%c24_44, %c0_45], %64 {strides = array<i32>} : memref<72x384xbf16, #tpu.memory_space<vmem>>, vector<8x384xbf16>,
    %66 = arith.truncf %53 : vector<8x384xf32> to vector<8x384xbf16>
    %c32_46 = arith.constant 32 : index
    %c0_47 = arith.constant 0 : index
    %67 = vector.load %arg10[%c32_46, %c0_47] : memref<72x384xbf16, #tpu.memory_space<vmem>>, vector<8x384xbf16>
    tpu.vector_store %arg10[%c32_46, %c0_47], %66 {strides = array<i32>} : memref<72x384xbf16, #tpu.memory_space<vmem>>, vector<8x384xbf16>,
    %c383_i32_48 = arith.constant 383 : i32
    %68 = tpu.dynamic_rotate %53 by %c383_i32_48 dim 1 : vector<8x384xf32>, i32 -> vector<8x384xf32>
    %69 = arith.truncf %68 : vector<8x384xf32> to vector<8x384xbf16>
    %c40_49 = arith.constant 40 : index
    %c0_50 = arith.constant 0 : index
    %70 = vector.load %arg10[%c40_49, %c0_50] : memref<72x384xbf16, #tpu.memory_space<vmem>>, vector<8x384xbf16>
    tpu.vector_store %arg10[%c40_49, %c0_50], %69 {strides = array<i32>} : memref<72x384xbf16, #tpu.memory_space<vmem>>, vector<8x384xbf16>,
    %c367_i32_51 = arith.constant 367 : i32
    %71 = tpu.dynamic_rotate %53 by %c367_i32_51 dim 1 : vector<8x384xf32>, i32 -> vector<8x384xf32>
    %72 = arith.truncf %71 : vector<8x384xf32> to vector<8x384xbf16>
    %c48_52 = arith.constant 48 : index
    %c0_53 = arith.constant 0 : index
    %73 = vector.load %arg10[%c48_52, %c0_53] : memref<72x384xbf16, #tpu.memory_space<vmem>>, vector<8x384xbf16>
    tpu.vector_store %arg10[%c48_52, %c0_53], %72 {strides = array<i32>} : memref<72x384xbf16, #tpu.memory_space<vmem>>, vector<8x384xbf16>,
    %c366_i32_54 = arith.constant 366 : i32
    %74 = tpu.dynamic_rotate %53 by %c366_i32_54 dim 1 : vector<8x384xf32>, i32 -> vector<8x384xf32>
    %75 = arith.truncf %74 : vector<8x384xf32> to vector<8x384xbf16>
    %c56_55 = arith.constant 56 : index
    %c0_56 = arith.constant 0 : index
    %76 = vector.load %arg10[%c56_55, %c0_56] : memref<72x384xbf16, #tpu.memory_space<vmem>>, vector<8x384xbf16>
    tpu.vector_store %arg10[%c56_55, %c0_56], %75 {strides = array<i32>} : memref<72x384xbf16, #tpu.memory_space<vmem>>, vector<8x384xbf16>,
    %c365_i32_57 = arith.constant 365 : i32
    %77 = tpu.dynamic_rotate %53 by %c365_i32_57 dim 1 : vector<8x384xf32>, i32 -> vector<8x384xf32>
    %78 = arith.truncf %77 : vector<8x384xf32> to vector<8x384xbf16>
    %c64_58 = arith.constant 64 : index
    %c0_59 = arith.constant 0 : index
    %79 = vector.load %arg10[%c64_58, %c0_59] : memref<72x384xbf16, #tpu.memory_space<vmem>>, vector<8x384xbf16>
    tpu.vector_store %arg10[%c64_58, %c0_59], %78 {strides = array<i32>} : memref<72x384xbf16, #tpu.memory_space<vmem>>, vector<8x384xbf16>,
    %c0_60 = arith.constant 0 : index
    %c0_61 = arith.constant 0 : index
    %80 = vector.load %arg10[%c0_60, %c0_61] : memref<72x384xbf16, #tpu.memory_space<vmem>>, vector<72x384xbf16>
    %cst_62 = arith.constant dense<0.000000e+00> : vector<32x384xf32>
    %81 = tpu.matmul %3, %80, %cst_62 {dimension_numbers = #tpu.dot_dimension_numbers<[1], [0], [0], [1], [0, 0, 1, 1], [], []>} : vector<32x72xbf16>, vector<72x384xbf16>, vector<32x384xf32> -> vector<32x384xf32>
    %82 = vector.broadcast %4 : vector<32x1xf32> to vector<32x384xf32>
    %83 = arith.addf %81, %82 : vector<32x384xf32>
    %cst_63 = arith.constant 0.000000e+00 : f32
    %84 = vector.broadcast %cst_63 : f32 to vector<32x384xf32>
    %85 = arith.maximumf %83, %84 : vector<32x384xf32>
    %86 = arith.truncf %85 : vector<32x384xf32> to vector<32x384xbf16>
    %cst_64 = arith.constant dense<0.000000e+00> : vector<8x384xf32>
    %87 = tpu.matmul %5, %86, %cst_64 {dimension_numbers = #tpu.dot_dimension_numbers<[1], [0], [0], [1], [0, 0, 1, 1], [], []>} : vector<8x32xbf16>, vector<32x384xbf16>, vector<8x384xf32> -> vector<8x384xf32>
    %88 = vector.broadcast %6 : vector<8x1xf32> to vector<8x384xf32>
    %89 = arith.addf %87, %88 : vector<8x384xf32>
    %90 = math.tanh %89 : vector<8x384xf32>
    %91 = arith.addf %53, %90 : vector<8x384xf32>
    %92 = vector.broadcast %7 : vector<1x384xf32> to vector<8x384xf32>
    %93 = arith.mulf %91, %92 : vector<8x384xf32>
    %c0_65 = arith.constant 0 : index
    %c0_66 = arith.constant 0 : index
    %94 = vector.load %arg9[%c0_65, %c0_66] : memref<8x384xf32, #tpu.memory_space<vmem>>, vector<8x384xf32>
    tpu.vector_store %arg9[%c0_65, %c0_66], %93 {strides = array<i32>} : memref<8x384xf32, #tpu.memory_space<vmem>>, vector<8x384xf32>,
    %c0_67 = arith.constant 0 : index
    %c1 = arith.constant 1 : index
    %c0_68 = arith.constant 0 : index
    %c0_69 = arith.constant 0 : index
    %95 = vector.load %arg8[%c0_67, %c1, %c0_68, %c0_69] : memref<1x5x8x384xf32, #tpu.memory_space<vmem>>, vector<1x1x8x384xf32>
    %96 = vector.shape_cast %95 : vector<1x1x8x384xf32> to vector<8x384xf32>
    %97 = vector.shape_cast %93 : vector<8x384xf32> to vector<1x1x8x384xf32>
    tpu.vector_store %arg8[%c0_67, %c1, %c0_68, %c0_69], %97 {strides = array<i32>} : memref<1x5x8x384xf32, #tpu.memory_space<vmem>>, vector<1x1x8x384xf32>,
    %c0_70 = arith.constant 0 : index
    %c0_71 = arith.constant 0 : index
    %98 = vector.load %arg9[%c0_70, %c0_71] : memref<8x384xf32, #tpu.memory_space<vmem>>, vector<8x384xf32>
    %c19_i32_72 = arith.constant 19 : i32
    %99 = tpu.dynamic_rotate %98 by %c19_i32_72 dim 1 : vector<8x384xf32>, i32 -> vector<8x384xf32>
    %100 = arith.truncf %99 : vector<8x384xf32> to vector<8x384xbf16>
    %c0_73 = arith.constant 0 : index
    %c0_74 = arith.constant 0 : index
    %101 = vector.load %arg10[%c0_73, %c0_74] : memref<72x384xbf16, #tpu.memory_space<vmem>>, vector<8x384xbf16>
    tpu.vector_store %arg10[%c0_73, %c0_74], %100 {strides = array<i32>} : memref<72x384xbf16, #tpu.memory_space<vmem>>, vector<8x384xbf16>,
    %c18_i32_75 = arith.constant 18 : i32
    %102 = tpu.dynamic_rotate %98 by %c18_i32_75 dim 1 : vector<8x384xf32>, i32 -> vector<8x384xf32>
    %103 = arith.truncf %102 : vector<8x384xf32> to vector<8x384xbf16>
    %c8_76 = arith.constant 8 : index
    %c0_77 = arith.constant 0 : index
    %104 = vector.load %arg10[%c8_76, %c0_77] : memref<72x384xbf16, #tpu.memory_space<vmem>>, vector<8x384xbf16>
    tpu.vector_store %arg10[%c8_76, %c0_77], %103 {strides = array<i32>} : memref<72x384xbf16, #tpu.memory_space<vmem>>, vector<8x384xbf16>,
    %c17_i32_78 = arith.constant 17 : i32
    %105 = tpu.dynamic_rotate %98 by %c17_i32_78 dim 1 : vector<8x384xf32>, i32 -> vector<8x384xf32>
    %106 = arith.truncf %105 : vector<8x384xf32> to vector<8x384xbf16>
    %c16_79 = arith.constant 16 : index
    %c0_80 = arith.constant 0 : index
    %107 = vector.load %arg10[%c16_79, %c0_80] : memref<72x384xbf16, #tpu.memory_space<vmem>>, vector<8x384xbf16>
    tpu.vector_store %arg10[%c16_79, %c0_80], %106 {strides = array<i32>} : memref<72x384xbf16, #tpu.memory_space<vmem>>, vector<8x384xbf16>,
    %c1_i32_81 = arith.constant 1 : i32
    %108 = tpu.dynamic_rotate %98 by %c1_i32_81 dim 1 : vector<8x384xf32>, i32 -> vector<8x384xf32>
    %109 = arith.truncf %108 : vector<8x384xf32> to vector<8x384xbf16>
    %c24_82 = arith.constant 24 : index
    %c0_83 = arith.constant 0 : index
    %110 = vector.load %arg10[%c24_82, %c0_83] : memref<72x384xbf16, #tpu.memory_space<vmem>>, vector<8x384xbf16>
    tpu.vector_store %arg10[%c24_82, %c0_83], %109 {strides = array<i32>} : memref<72x384xbf16, #tpu.memory_space<vmem>>, vector<8x384xbf16>,
    %111 = arith.truncf %98 : vector<8x384xf32> to vector<8x384xbf16>
    %c32_84 = arith.constant 32 : index
    %c0_85 = arith.constant 0 : index
    %112 = vector.load %arg10[%c32_84, %c0_85] : memref<72x384xbf16, #tpu.memory_space<vmem>>, vector<8x384xbf16>
    tpu.vector_store %arg10[%c32_84, %c0_85], %111 {strides = array<i32>} : memref<72x384xbf16, #tpu.memory_space<vmem>>, vector<8x384xbf16>,
    %c383_i32_86 = arith.constant 383 : i32
    %113 = tpu.dynamic_rotate %98 by %c383_i32_86 dim 1 : vector<8x384xf32>, i32 -> vector<8x384xf32>
    %114 = arith.truncf %113 : vector<8x384xf32> to vector<8x384xbf16>
    %c40_87 = arith.constant 40 : index
    %c0_88 = arith.constant 0 : index
    %115 = vector.load %arg10[%c40_87, %c0_88] : memref<72x384xbf16, #tpu.memory_space<vmem>>, vector<8x384xbf16>
    tpu.vector_store %arg10[%c40_87, %c0_88], %114 {strides = array<i32>} : memref<72x384xbf16, #tpu.memory_space<vmem>>, vector<8x384xbf16>,
    %c367_i32_89 = arith.constant 367 : i32
    %116 = tpu.dynamic_rotate %98 by %c367_i32_89 dim 1 : vector<8x384xf32>, i32 -> vector<8x384xf32>
    %117 = arith.truncf %116 : vector<8x384xf32> to vector<8x384xbf16>
    %c48_90 = arith.constant 48 : index
    %c0_91 = arith.constant 0 : index
    %118 = vector.load %arg10[%c48_90, %c0_91] : memref<72x384xbf16, #tpu.memory_space<vmem>>, vector<8x384xbf16>
    tpu.vector_store %arg10[%c48_90, %c0_91], %117 {strides = array<i32>} : memref<72x384xbf16, #tpu.memory_space<vmem>>, vector<8x384xbf16>,
    %c366_i32_92 = arith.constant 366 : i32
    %119 = tpu.dynamic_rotate %98 by %c366_i32_92 dim 1 : vector<8x384xf32>, i32 -> vector<8x384xf32>
    %120 = arith.truncf %119 : vector<8x384xf32> to vector<8x384xbf16>
    %c56_93 = arith.constant 56 : index
    %c0_94 = arith.constant 0 : index
    %121 = vector.load %arg10[%c56_93, %c0_94] : memref<72x384xbf16, #tpu.memory_space<vmem>>, vector<8x384xbf16>
    tpu.vector_store %arg10[%c56_93, %c0_94], %120 {strides = array<i32>} : memref<72x384xbf16, #tpu.memory_space<vmem>>, vector<8x384xbf16>,
    %c365_i32_95 = arith.constant 365 : i32
    %122 = tpu.dynamic_rotate %98 by %c365_i32_95 dim 1 : vector<8x384xf32>, i32 -> vector<8x384xf32>
    %123 = arith.truncf %122 : vector<8x384xf32> to vector<8x384xbf16>
    %c64_96 = arith.constant 64 : index
    %c0_97 = arith.constant 0 : index
    %124 = vector.load %arg10[%c64_96, %c0_97] : memref<72x384xbf16, #tpu.memory_space<vmem>>, vector<8x384xbf16>
    tpu.vector_store %arg10[%c64_96, %c0_97], %123 {strides = array<i32>} : memref<72x384xbf16, #tpu.memory_space<vmem>>, vector<8x384xbf16>,
    %c0_98 = arith.constant 0 : index
    %c0_99 = arith.constant 0 : index
    %125 = vector.load %arg10[%c0_98, %c0_99] : memref<72x384xbf16, #tpu.memory_space<vmem>>, vector<72x384xbf16>
    %cst_100 = arith.constant dense<0.000000e+00> : vector<32x384xf32>
    %126 = tpu.matmul %3, %125, %cst_100 {dimension_numbers = #tpu.dot_dimension_numbers<[1], [0], [0], [1], [0, 0, 1, 1], [], []>} : vector<32x72xbf16>, vector<72x384xbf16>, vector<32x384xf32> -> vector<32x384xf32>
    %127 = vector.broadcast %4 : vector<32x1xf32> to vector<32x384xf32>
    %128 = arith.addf %126, %127 : vector<32x384xf32>
    %cst_101 = arith.constant 0.000000e+00 : f32
    %129 = vector.broadcast %cst_101 : f32 to vector<32x384xf32>
    %130 = arith.maximumf %128, %129 : vector<32x384xf32>
    %131 = arith.truncf %130 : vector<32x384xf32> to vector<32x384xbf16>
    %cst_102 = arith.constant dense<0.000000e+00> : vector<8x384xf32>
    %132 = tpu.matmul %5, %131, %cst_102 {dimension_numbers = #tpu.dot_dimension_numbers<[1], [0], [0], [1], [0, 0, 1, 1], [], []>} : vector<8x32xbf16>, vector<32x384xbf16>, vector<8x384xf32> -> vector<8x384xf32>
    %133 = vector.broadcast %6 : vector<8x1xf32> to vector<8x384xf32>
    %134 = arith.addf %132, %133 : vector<8x384xf32>
    %135 = math.tanh %134 : vector<8x384xf32>
    %136 = arith.addf %98, %135 : vector<8x384xf32>
    %137 = vector.broadcast %7 : vector<1x384xf32> to vector<8x384xf32>
    %138 = arith.mulf %136, %137 : vector<8x384xf32>
    %c0_103 = arith.constant 0 : index
    %c0_104 = arith.constant 0 : index
    %139 = vector.load %arg9[%c0_103, %c0_104] : memref<8x384xf32, #tpu.memory_space<vmem>>, vector<8x384xf32>
    tpu.vector_store %arg9[%c0_103, %c0_104], %138 {strides = array<i32>} : memref<8x384xf32, #tpu.memory_space<vmem>>, vector<8x384xf32>,
    %c0_105 = arith.constant 0 : index
    %c2 = arith.constant 2 : index
    %c0_106 = arith.constant 0 : index
    %c0_107 = arith.constant 0 : index
    %140 = vector.load %arg8[%c0_105, %c2, %c0_106, %c0_107] : memref<1x5x8x384xf32, #tpu.memory_space<vmem>>, vector<1x1x8x384xf32>
    %141 = vector.shape_cast %140 : vector<1x1x8x384xf32> to vector<8x384xf32>
    %142 = vector.shape_cast %138 : vector<8x384xf32> to vector<1x1x8x384xf32>
    tpu.vector_store %arg8[%c0_105, %c2, %c0_106, %c0_107], %142 {strides = array<i32>} : memref<1x5x8x384xf32, #tpu.memory_space<vmem>>, vector<1x1x8x384xf32>,
    %c0_108 = arith.constant 0 : index
    %c0_109 = arith.constant 0 : index
    %143 = vector.load %arg9[%c0_108, %c0_109] : memref<8x384xf32, #tpu.memory_space<vmem>>, vector<8x384xf32>
    %c19_i32_110 = arith.constant 19 : i32
    %144 = tpu.dynamic_rotate %143 by %c19_i32_110 dim 1 : vector<8x384xf32>, i32 -> vector<8x384xf32>
    %145 = arith.truncf %144 : vector<8x384xf32> to vector<8x384xbf16>
    %c0_111 = arith.constant 0 : index
    %c0_112 = arith.constant 0 : index
    %146 = vector.load %arg10[%c0_111, %c0_112] : memref<72x384xbf16, #tpu.memory_space<vmem>>, vector<8x384xbf16>
    tpu.vector_store %arg10[%c0_111, %c0_112], %145 {strides = array<i32>} : memref<72x384xbf16, #tpu.memory_space<vmem>>, vector<8x384xbf16>,
    %c18_i32_113 = arith.constant 18 : i32
    %147 = tpu.dynamic_rotate %143 by %c18_i32_113 dim 1 : vector<8x384xf32>, i32 -> vector<8x384xf32>
    %148 = arith.truncf %147 : vector<8x384xf32> to vector<8x384xbf16>
    %c8_114 = arith.constant 8 : index
    %c0_115 = arith.constant 0 : index
    %149 = vector.load %arg10[%c8_114, %c0_115] : memref<72x384xbf16, #tpu.memory_space<vmem>>, vector<8x384xbf16>
    tpu.vector_store %arg10[%c8_114, %c0_115], %148 {strides = array<i32>} : memref<72x384xbf16, #tpu.memory_space<vmem>>, vector<8x384xbf16>,
    %c17_i32_116 = arith.constant 17 : i32
    %150 = tpu.dynamic_rotate %143 by %c17_i32_116 dim 1 : vector<8x384xf32>, i32 -> vector<8x384xf32>
    %151 = arith.truncf %150 : vector<8x384xf32> to vector<8x384xbf16>
    %c16_117 = arith.constant 16 : index
    %c0_118 = arith.constant 0 : index
    %152 = vector.load %arg10[%c16_117, %c0_118] : memref<72x384xbf16, #tpu.memory_space<vmem>>, vector<8x384xbf16>
    tpu.vector_store %arg10[%c16_117, %c0_118], %151 {strides = array<i32>} : memref<72x384xbf16, #tpu.memory_space<vmem>>, vector<8x384xbf16>,
    %c1_i32_119 = arith.constant 1 : i32
    %153 = tpu.dynamic_rotate %143 by %c1_i32_119 dim 1 : vector<8x384xf32>, i32 -> vector<8x384xf32>
    %154 = arith.truncf %153 : vector<8x384xf32> to vector<8x384xbf16>
    %c24_120 = arith.constant 24 : index
    %c0_121 = arith.constant 0 : index
    %155 = vector.load %arg10[%c24_120, %c0_121] : memref<72x384xbf16, #tpu.memory_space<vmem>>, vector<8x384xbf16>
    tpu.vector_store %arg10[%c24_120, %c0_121], %154 {strides = array<i32>} : memref<72x384xbf16, #tpu.memory_space<vmem>>, vector<8x384xbf16>,
    %156 = arith.truncf %143 : vector<8x384xf32> to vector<8x384xbf16>
    %c32_122 = arith.constant 32 : index
    %c0_123 = arith.constant 0 : index
    %157 = vector.load %arg10[%c32_122, %c0_123] : memref<72x384xbf16, #tpu.memory_space<vmem>>, vector<8x384xbf16>
    tpu.vector_store %arg10[%c32_122, %c0_123], %156 {strides = array<i32>} : memref<72x384xbf16, #tpu.memory_space<vmem>>, vector<8x384xbf16>,
    %c383_i32_124 = arith.constant 383 : i32
    %158 = tpu.dynamic_rotate %143 by %c383_i32_124 dim 1 : vector<8x384xf32>, i32 -> vector<8x384xf32>
    %159 = arith.truncf %158 : vector<8x384xf32> to vector<8x384xbf16>
    %c40_125 = arith.constant 40 : index
    %c0_126 = arith.constant 0 : index
    %160 = vector.load %arg10[%c40_125, %c0_126] : memref<72x384xbf16, #tpu.memory_space<vmem>>, vector<8x384xbf16>
    tpu.vector_store %arg10[%c40_125, %c0_126], %159 {strides = array<i32>} : memref<72x384xbf16, #tpu.memory_space<vmem>>, vector<8x384xbf16>,
    %c367_i32_127 = arith.constant 367 : i32
    %161 = tpu.dynamic_rotate %143 by %c367_i32_127 dim 1 : vector<8x384xf32>, i32 -> vector<8x384xf32>
    %162 = arith.truncf %161 : vector<8x384xf32> to vector<8x384xbf16>
    %c48_128 = arith.constant 48 : index
    %c0_129 = arith.constant 0 : index
    %163 = vector.load %arg10[%c48_128, %c0_129] : memref<72x384xbf16, #tpu.memory_space<vmem>>, vector<8x384xbf16>
    tpu.vector_store %arg10[%c48_128, %c0_129], %162 {strides = array<i32>} : memref<72x384xbf16, #tpu.memory_space<vmem>>, vector<8x384xbf16>,
    %c366_i32_130 = arith.constant 366 : i32
    %164 = tpu.dynamic_rotate %143 by %c366_i32_130 dim 1 : vector<8x384xf32>, i32 -> vector<8x384xf32>
    %165 = arith.truncf %164 : vector<8x384xf32> to vector<8x384xbf16>
    %c56_131 = arith.constant 56 : index
    %c0_132 = arith.constant 0 : index
    %166 = vector.load %arg10[%c56_131, %c0_132] : memref<72x384xbf16, #tpu.memory_space<vmem>>, vector<8x384xbf16>
    tpu.vector_store %arg10[%c56_131, %c0_132], %165 {strides = array<i32>} : memref<72x384xbf16, #tpu.memory_space<vmem>>, vector<8x384xbf16>,
    %c365_i32_133 = arith.constant 365 : i32
    %167 = tpu.dynamic_rotate %143 by %c365_i32_133 dim 1 : vector<8x384xf32>, i32 -> vector<8x384xf32>
    %168 = arith.truncf %167 : vector<8x384xf32> to vector<8x384xbf16>
    %c64_134 = arith.constant 64 : index
    %c0_135 = arith.constant 0 : index
    %169 = vector.load %arg10[%c64_134, %c0_135] : memref<72x384xbf16, #tpu.memory_space<vmem>>, vector<8x384xbf16>
    tpu.vector_store %arg10[%c64_134, %c0_135], %168 {strides = array<i32>} : memref<72x384xbf16, #tpu.memory_space<vmem>>, vector<8x384xbf16>,
    %c0_136 = arith.constant 0 : index
    %c0_137 = arith.constant 0 : index
    %170 = vector.load %arg10[%c0_136, %c0_137] : memref<72x384xbf16, #tpu.memory_space<vmem>>, vector<72x384xbf16>
    %cst_138 = arith.constant dense<0.000000e+00> : vector<32x384xf32>
    %171 = tpu.matmul %3, %170, %cst_138 {dimension_numbers = #tpu.dot_dimension_numbers<[1], [0], [0], [1], [0, 0, 1, 1], [], []>} : vector<32x72xbf16>, vector<72x384xbf16>, vector<32x384xf32> -> vector<32x384xf32>
    %172 = vector.broadcast %4 : vector<32x1xf32> to vector<32x384xf32>
    %173 = arith.addf %171, %172 : vector<32x384xf32>
    %cst_139 = arith.constant 0.000000e+00 : f32
    %174 = vector.broadcast %cst_139 : f32 to vector<32x384xf32>
    %175 = arith.maximumf %173, %174 : vector<32x384xf32>
    %176 = arith.truncf %175 : vector<32x384xf32> to vector<32x384xbf16>
    %cst_140 = arith.constant dense<0.000000e+00> : vector<8x384xf32>
    %177 = tpu.matmul %5, %176, %cst_140 {dimension_numbers = #tpu.dot_dimension_numbers<[1], [0], [0], [1], [0, 0, 1, 1], [], []>} : vector<8x32xbf16>, vector<32x384xbf16>, vector<8x384xf32> -> vector<8x384xf32>
    %178 = vector.broadcast %6 : vector<8x1xf32> to vector<8x384xf32>
    %179 = arith.addf %177, %178 : vector<8x384xf32>
    %180 = math.tanh %179 : vector<8x384xf32>
    %181 = arith.addf %143, %180 : vector<8x384xf32>
    %182 = vector.broadcast %7 : vector<1x384xf32> to vector<8x384xf32>
    %183 = arith.mulf %181, %182 : vector<8x384xf32>
    %c0_141 = arith.constant 0 : index
    %c0_142 = arith.constant 0 : index
    %184 = vector.load %arg9[%c0_141, %c0_142] : memref<8x384xf32, #tpu.memory_space<vmem>>, vector<8x384xf32>
    tpu.vector_store %arg9[%c0_141, %c0_142], %183 {strides = array<i32>} : memref<8x384xf32, #tpu.memory_space<vmem>>, vector<8x384xf32>,
    %c0_143 = arith.constant 0 : index
    %c3 = arith.constant 3 : index
    %c0_144 = arith.constant 0 : index
    %c0_145 = arith.constant 0 : index
    %185 = vector.load %arg8[%c0_143, %c3, %c0_144, %c0_145] : memref<1x5x8x384xf32, #tpu.memory_space<vmem>>, vector<1x1x8x384xf32>
    %186 = vector.shape_cast %185 : vector<1x1x8x384xf32> to vector<8x384xf32>
    %187 = vector.shape_cast %183 : vector<8x384xf32> to vector<1x1x8x384xf32>
    tpu.vector_store %arg8[%c0_143, %c3, %c0_144, %c0_145], %187 {strides = array<i32>} : memref<1x5x8x384xf32, #tpu.memory_space<vmem>>, vector<1x1x8x384xf32>,
    %c0_146 = arith.constant 0 : index
    %c0_147 = arith.constant 0 : index
    %188 = vector.load %arg9[%c0_146, %c0_147] : memref<8x384xf32, #tpu.memory_space<vmem>>, vector<8x384xf32>
    %c19_i32_148 = arith.constant 19 : i32
    %189 = tpu.dynamic_rotate %188 by %c19_i32_148 dim 1 : vector<8x384xf32>, i32 -> vector<8x384xf32>
    %190 = arith.truncf %189 : vector<8x384xf32> to vector<8x384xbf16>
    %c0_149 = arith.constant 0 : index
    %c0_150 = arith.constant 0 : index
    %191 = vector.load %arg10[%c0_149, %c0_150] : memref<72x384xbf16, #tpu.memory_space<vmem>>, vector<8x384xbf16>
    tpu.vector_store %arg10[%c0_149, %c0_150], %190 {strides = array<i32>} : memref<72x384xbf16, #tpu.memory_space<vmem>>, vector<8x384xbf16>,
    %c18_i32_151 = arith.constant 18 : i32
    %192 = tpu.dynamic_rotate %188 by %c18_i32_151 dim 1 : vector<8x384xf32>, i32 -> vector<8x384xf32>
    %193 = arith.truncf %192 : vector<8x384xf32> to vector<8x384xbf16>
    %c8_152 = arith.constant 8 : index
    %c0_153 = arith.constant 0 : index
    %194 = vector.load %arg10[%c8_152, %c0_153] : memref<72x384xbf16, #tpu.memory_space<vmem>>, vector<8x384xbf16>
    tpu.vector_store %arg10[%c8_152, %c0_153], %193 {strides = array<i32>} : memref<72x384xbf16, #tpu.memory_space<vmem>>, vector<8x384xbf16>,
    %c17_i32_154 = arith.constant 17 : i32
    %195 = tpu.dynamic_rotate %188 by %c17_i32_154 dim 1 : vector<8x384xf32>, i32 -> vector<8x384xf32>
    %196 = arith.truncf %195 : vector<8x384xf32> to vector<8x384xbf16>
    %c16_155 = arith.constant 16 : index
    %c0_156 = arith.constant 0 : index
    %197 = vector.load %arg10[%c16_155, %c0_156] : memref<72x384xbf16, #tpu.memory_space<vmem>>, vector<8x384xbf16>
    tpu.vector_store %arg10[%c16_155, %c0_156], %196 {strides = array<i32>} : memref<72x384xbf16, #tpu.memory_space<vmem>>, vector<8x384xbf16>,
    %c1_i32_157 = arith.constant 1 : i32
    %198 = tpu.dynamic_rotate %188 by %c1_i32_157 dim 1 : vector<8x384xf32>, i32 -> vector<8x384xf32>
    %199 = arith.truncf %198 : vector<8x384xf32> to vector<8x384xbf16>
    %c24_158 = arith.constant 24 : index
    %c0_159 = arith.constant 0 : index
    %200 = vector.load %arg10[%c24_158, %c0_159] : memref<72x384xbf16, #tpu.memory_space<vmem>>, vector<8x384xbf16>
    tpu.vector_store %arg10[%c24_158, %c0_159], %199 {strides = array<i32>} : memref<72x384xbf16, #tpu.memory_space<vmem>>, vector<8x384xbf16>,
    %201 = arith.truncf %188 : vector<8x384xf32> to vector<8x384xbf16>
    %c32_160 = arith.constant 32 : index
    %c0_161 = arith.constant 0 : index
    %202 = vector.load %arg10[%c32_160, %c0_161] : memref<72x384xbf16, #tpu.memory_space<vmem>>, vector<8x384xbf16>
    tpu.vector_store %arg10[%c32_160, %c0_161], %201 {strides = array<i32>} : memref<72x384xbf16, #tpu.memory_space<vmem>>, vector<8x384xbf16>,
    %c383_i32_162 = arith.constant 383 : i32
    %203 = tpu.dynamic_rotate %188 by %c383_i32_162 dim 1 : vector<8x384xf32>, i32 -> vector<8x384xf32>
    %204 = arith.truncf %203 : vector<8x384xf32> to vector<8x384xbf16>
    %c40_163 = arith.constant 40 : index
    %c0_164 = arith.constant 0 : index
    %205 = vector.load %arg10[%c40_163, %c0_164] : memref<72x384xbf16, #tpu.memory_space<vmem>>, vector<8x384xbf16>
    tpu.vector_store %arg10[%c40_163, %c0_164], %204 {strides = array<i32>} : memref<72x384xbf16, #tpu.memory_space<vmem>>, vector<8x384xbf16>,
    %c367_i32_165 = arith.constant 367 : i32
    %206 = tpu.dynamic_rotate %188 by %c367_i32_165 dim 1 : vector<8x384xf32>, i32 -> vector<8x384xf32>
    %207 = arith.truncf %206 : vector<8x384xf32> to vector<8x384xbf16>
    %c48_166 = arith.constant 48 : index
    %c0_167 = arith.constant 0 : index
    %208 = vector.load %arg10[%c48_166, %c0_167] : memref<72x384xbf16, #tpu.memory_space<vmem>>, vector<8x384xbf16>
    tpu.vector_store %arg10[%c48_166, %c0_167], %207 {strides = array<i32>} : memref<72x384xbf16, #tpu.memory_space<vmem>>, vector<8x384xbf16>,
    %c366_i32_168 = arith.constant 366 : i32
    %209 = tpu.dynamic_rotate %188 by %c366_i32_168 dim 1 : vector<8x384xf32>, i32 -> vector<8x384xf32>
    %210 = arith.truncf %209 : vector<8x384xf32> to vector<8x384xbf16>
    %c56_169 = arith.constant 56 : index
    %c0_170 = arith.constant 0 : index
    %211 = vector.load %arg10[%c56_169, %c0_170] : memref<72x384xbf16, #tpu.memory_space<vmem>>, vector<8x384xbf16>
    tpu.vector_store %arg10[%c56_169, %c0_170], %210 {strides = array<i32>} : memref<72x384xbf16, #tpu.memory_space<vmem>>, vector<8x384xbf16>,
    %c365_i32_171 = arith.constant 365 : i32
    %212 = tpu.dynamic_rotate %188 by %c365_i32_171 dim 1 : vector<8x384xf32>, i32 -> vector<8x384xf32>
    %213 = arith.truncf %212 : vector<8x384xf32> to vector<8x384xbf16>
    %c64_172 = arith.constant 64 : index
    %c0_173 = arith.constant 0 : index
    %214 = vector.load %arg10[%c64_172, %c0_173] : memref<72x384xbf16, #tpu.memory_space<vmem>>, vector<8x384xbf16>
    tpu.vector_store %arg10[%c64_172, %c0_173], %213 {strides = array<i32>} : memref<72x384xbf16, #tpu.memory_space<vmem>>, vector<8x384xbf16>,
    %c0_174 = arith.constant 0 : index
    %c0_175 = arith.constant 0 : index
    %215 = vector.load %arg10[%c0_174, %c0_175] : memref<72x384xbf16, #tpu.memory_space<vmem>>, vector<72x384xbf16>
    %cst_176 = arith.constant dense<0.000000e+00> : vector<32x384xf32>
    %216 = tpu.matmul %3, %215, %cst_176 {dimension_numbers = #tpu.dot_dimension_numbers<[1], [0], [0], [1], [0, 0, 1, 1], [], []>} : vector<32x72xbf16>, vector<72x384xbf16>, vector<32x384xf32> -> vector<32x384xf32>
    %217 = vector.broadcast %4 : vector<32x1xf32> to vector<32x384xf32>
    %218 = arith.addf %216, %217 : vector<32x384xf32>
    %cst_177 = arith.constant 0.000000e+00 : f32
    %219 = vector.broadcast %cst_177 : f32 to vector<32x384xf32>
    %220 = arith.maximumf %218, %219 : vector<32x384xf32>
    %221 = arith.truncf %220 : vector<32x384xf32> to vector<32x384xbf16>
    %cst_178 = arith.constant dense<0.000000e+00> : vector<8x384xf32>
    %222 = tpu.matmul %5, %221, %cst_178 {dimension_numbers = #tpu.dot_dimension_numbers<[1], [0], [0], [1], [0, 0, 1, 1], [], []>} : vector<8x32xbf16>, vector<32x384xbf16>, vector<8x384xf32> -> vector<8x384xf32>
    %223 = vector.broadcast %6 : vector<8x1xf32> to vector<8x384xf32>
    %224 = arith.addf %222, %223 : vector<8x384xf32>
    %225 = math.tanh %224 : vector<8x384xf32>
    %226 = arith.addf %188, %225 : vector<8x384xf32>
    %227 = vector.broadcast %7 : vector<1x384xf32> to vector<8x384xf32>
    %228 = arith.mulf %226, %227 : vector<8x384xf32>
    %c0_179 = arith.constant 0 : index
    %c0_180 = arith.constant 0 : index
    %229 = vector.load %arg9[%c0_179, %c0_180] : memref<8x384xf32, #tpu.memory_space<vmem>>, vector<8x384xf32>
    tpu.vector_store %arg9[%c0_179, %c0_180], %228 {strides = array<i32>} : memref<8x384xf32, #tpu.memory_space<vmem>>, vector<8x384xf32>,
    %c0_181 = arith.constant 0 : index
    %c4 = arith.constant 4 : index
    %c0_182 = arith.constant 0 : index
    %c0_183 = arith.constant 0 : index
    %230 = vector.load %arg8[%c0_181, %c4, %c0_182, %c0_183] : memref<1x5x8x384xf32, #tpu.memory_space<vmem>>, vector<1x1x8x384xf32>
    %231 = vector.shape_cast %230 : vector<1x1x8x384xf32> to vector<8x384xf32>
    %232 = vector.shape_cast %228 : vector<8x384xf32> to vector<1x1x8x384xf32>
    tpu.vector_store %arg8[%c0_181, %c4, %c0_182, %c0_183], %232 {strides = array<i32>} : memref<1x5x8x384xf32, #tpu.memory_space<vmem>>, vector<1x1x8x384xf32>,
    return
  }
  func.func @transform_1(%arg0: i32, %arg1: i32) -> (i32, i32) {
    %c0_i32 = arith.constant 0 : i32
    %c0_i32_0 = arith.constant 0 : i32
    %c0_i32_1 = arith.constant 0 : i32
    return %c0_i32, %c0_i32_0 : i32, i32
  }
  func.func @transform_2(%arg0: i32, %arg1: i32) -> (i32, i32) {
    %c0_i32 = arith.constant 0 : i32
    %c0_i32_0 = arith.constant 0 : i32
    %c0_i32_1 = arith.constant 0 : i32
    return %c0_i32, %c0_i32_0 : i32, i32
  }
  func.func @transform_3(%arg0: i32, %arg1: i32) -> (i32, i32) {
    %c0_i32 = arith.constant 0 : i32
    %c0_i32_0 = arith.constant 0 : i32
    %c0_i32_1 = arith.constant 0 : i32
    return %c0_i32, %c0_i32_0 : i32, i32
  }
  func.func @transform_4(%arg0: i32, %arg1: i32) -> (i32, i32) {
    %c0_i32 = arith.constant 0 : i32
    %c0_i32_0 = arith.constant 0 : i32
    %c0_i32_1 = arith.constant 0 : i32
    return %c0_i32, %c0_i32_0 : i32, i32
  }
  func.func @transform_5(%arg0: i32, %arg1: i32) -> (i32, i32) {
    %c0_i32 = arith.constant 0 : i32
    %c0_i32_0 = arith.constant 0 : i32
    %c0_i32_1 = arith.constant 0 : i32
    return %c0_i32, %c0_i32_0 : i32, i32
  }
  func.func @transform_6(%arg0: i32, %arg1: i32) -> (i32, i32, i32, i32) {
    %c0_i32 = arith.constant 0 : i32
    %c0_i32_0 = arith.constant 0 : i32
    %c0_i32_1 = arith.constant 0 : i32
    return %arg0, %arg1, %c0_i32, %c0_i32_0 : i32, i32, i32, i32
  }
}

</mosaic_0001>

<bundles_post_ra>
// kernel: tpu_custom_call.1
= control target key start
LH: loop header
LB: loop body
LE: loop exit
PB: predicated region body
PF: predicated region fallthrough
CT: control target
= control target key end

     0   :  { %11 = vsyncpa [#allocation5], 0  ;;  %s4919_s0 = inlined_call_operand.hbm [shape: f32[2,8,384], index: 0, kind: input, shape index: {}]   ;;  %s4920_s1 = inlined_call_operand.vmem [shape: f32[1,384], index: 1, kind: input, shape index: {}]   ;;  %s4921_s2 = inlined_call_operand.vmem [shape: bf16[32,72], index: 2, kind: input, shape index: {}]   ;;  %s4922_s3 = inlined_call_operand.vmem [shape: f32[32,1], index: 3, kind: input, shape index: {}]   ;;  %s4923_s4 = inlined_call_operand.vmem [shape: bf16[8,32], index: 4, kind: input, shape index: {}]   ;;  %s4924_s5 = inlined_call_operand.vmem [shape: f32[8,1], index: 5, kind: input, shape index: {}]   ;;  %s4925_s6 = inlined_call_operand.hbm [shape: f32[2,5,8,384], index: 6, kind: output, shape index: {}]  }
   0x1   :  { %13 = vsyncpa [#allocation5 + $0x1], 0  ;;  %s4048_s21 = smov 0   ;;  %s4050_s22 = smov 0  }
   0x2   :  { %s4052_s23 = smov 0   ;;  %s4054_s24 = smov 0  }
   0x3   :  { %s4056_s25 = smov 0   ;;  %s4058_s26 = smov 0  }
   0x4 LB: > { %s3035_s27 = sadd.s32 4294967295, %s3996_s26   ;;  %s3036_s28 = sadd.s32 4294967294, %s3996_s26   ;;  %s3996_s26 = sphi %s4058_s26, %s19_s26   ;;  %s3992_s25 = sphi %s4056_s25, %s4949_s25   ;;  %s3988_s24 = sphi %s4054_s24, %s4948_s24   ;;  %s3984_s23 = sphi %s4052_s23, %s4947_s23   ;;  %s3980_s22 = sphi %s4050_s22, %s4946_s22   ;;  %s3976_s21 = sphi %s4048_s21, %s4945_s21  }
   0x5   : > { %s31_s29 = sadd.s32 1, %s3992_s25  ;;  %s145_s30 = sadd.s32 1, %s3984_s23 }
   0x6   : > { %p33_p0 = scmp.ge.s32.totalorder %s31_s29, 2  ;;  %p155_p1 = scmp.ne.s32.totalorder %s3984_s23, %s3980_s22 }
   0x7   : > { %p156_p2 = scmp.eq.s32.totalorder %s3035_s27, 1  ;;  %p161_p3 = scmp.ne.s32.totalorder %s3980_s22, %s3976_s21 }
   0x8   : > { %s4951_s29 = smov (%p33_p0, %s31_s29), 0  ;;  %p162_p5 = scmp.eq.s32.totalorder %s3036_s28, 1 }
   0x9   : > { %4936 = sst [smem:[#allocation13_spill]] %s4951_s29  ;;  %p4088_p4 = por %p156_p2, %p155_p1 }
   0xa   : > { %s140_s8 = ssub.s32 %s3992_s25, %s4951_s29  ;;  %p3038_p6 = scmp.ge.s32.totalorder %s3996_s26, 1 }
   0xb   : > { %p143_p7 = scmp.eq.s32.totalorder %s140_s8, 0  ;;  %p4095_p8 = por %p162_p5, %p161_p3 }
   0xc   : > { %p195_p9 = scmp.lt.s32.totalorder %s3996_s26, 3 }
   0xd   : > { %s4101_s10 = scalar_select %p143_p7, %s3984_s23, %s145_s30  }
   0xe   : > { %p196_p10 = pnand %p3038_p6, %p195_p9 }
   0xf   : > { %s4927_s11 = sand.u32 (!%p196_p10), 1, %s3980_s22  }
  0x10   : > { %199 = sbr.rel (%p196_p10) target bundleno = 3007 (0xbbf), region = 40 }
  0x11   : > { %s3513_s12 = smul.u32 (!%p196_p10), 120, %s4927_s11 }
  0x13   : > { %s4106_s13 = scalar_lea.vmem (!%p196_p10), [#allocation4], %s3513_s12 }
  0x15   : > { %s3257_s14 = smul.u32 384, %s3988_s24  ;;  %s3998_s15 = smov [#allocation2]  }
  0x16   : > { %s234_s16 = sshll.u32 %s3998_s15, 4  ;;  %s3898_s30 = scalar_lea.hbm %s4919_s0, 768  ;;  %s235_s16 = int_to_ptr.vmem [resolvable:$true] %s234_s16 }
  0x17   : > { %s226_s19 = scalar_lea.hbm %s4919_s0, %s3257_s14 }
  0x18   : > { %s3896_s20 = scalar_lea.hbm %s226_s19, 384  ;;  %p3899_p12 = scmp.lt.s32.totalorder %s226_s19, %s4919_s0 }
  0x19   : > { %p3897_p11 = scmp.ne.s32.totalorder %s226_s19, %s3896_s20  ;;  %p3900_p13 = scmp.lt.s32.totalorder %s3898_s30, %s3896_s20 }
  0x1b   : > { %p3901_p0 = por %p3900_p13, %p3899_p12 }
  0x1d   : > { %p3902_p1 = pnand %p3901_p0, %p3897_p11 }
  0x1f   : > { %3905 = shalt.err (!%p3902_p1)  }
  0x20   : > { %s3906_s12 = scalar_lea.vmem %s235_s16, 384  ;;  %p3911_p3 = scmp.lt.s32.totalorder %s235_s16, %s235_s16 }
  0x21   : > { %p3907_p2 = scmp.ne.s32.totalorder %s235_s16, %s3906_s12  ;;  %p3912_p5 = scmp.lt.s32.totalorder %s3906_s12, %s3906_s12 }
  0x23   : > { %p3913_p6 = por %p3912_p5, %p3911_p3 }
  0x25   : > { %p3914_p7 = pnand %p3913_p6, %p3907_p2 }
  0x27   : > { %3917 = shalt.err (!%p3914_p7)  }
  0x28   : > { %237 = dma.hbm_to_vmem [thread:$0]  %s226_s19, 384, %s235_s16, [#allocation6] }
  0x29   : > { %3968 = dma.done.wait [#allocation6], 384 }
  0x2a   : > { %3969 = vsyncadd [#allocation6], 4294966912  ;;  %v4118_v0 = vld [vmem:[#allocation2] sm:$0xff]  ;;  %v4120_v1 = vld [vmem:[#allocation2 + $0x8] sm:$0xff]  ;;  %s3999_s29 = smov 111   ;;  %s4000_s14 = smov 109   ;;  %v262_v12 = vlaneseq }
  0x2b   : > { %v3589_v2 = vpack.i.bf16 %v4120_v1, %v4118_v0  ;;  %v4126_v3 = vld [vmem:[#allocation2 + $0x10] sm:$0xff]  ;;  %s4001_s15 = smov 110   ;;  %s4002_s16 = smov 127   ;;  %v4152_v5 = vld [vmem:[%s4921_s2] sm:$0xff]   ;;  %v4006_v6 = vmov 0   ;;  %vm593_vm0 = vcmask 588800  }
  0x2c   : > { %v3267_v4 = vpack.c.bf16 %v4126_v3, %v4126_v3  ;;  %s4934_s17 = smov 17   ;;  %s4930_s18 = smov 1   ;;  %642 = vmatprep.mubr.bf16.mxu0 %v4006_v6  ;;  %3625 = vset.pattern.permute.xlu1 %v4006_v6  ;;  %v249_v7 = vld [vmem:[%s4922_s3 + $0x18] sm:$0xff]  ;;  %v248_v8 = vld [vmem:[%s4922_s3 + $0x10] sm:$0xff]  ;;  %v246_v9 = vld [vmem:[%s4922_s3] sm:$0xff]  ;;  %v4178_v13 = vand.u32 127, %v262_v12 }
  0x2d   : > { %3590 = vrot.lane.b32.xlu1 %v3589_v2, %s3999_s29  ;;  %3585 = vrot.lane.b32.xlu0 %v3589_v2, %s4000_s14  ;;  %s4928_s19 = smov 19   ;;  %s4932_s28 = smov 18   ;;  %v247_v10 = vld [vmem:[%s4922_s3 + $0x8] sm:$0xff]  ;;  %v251_v11 = vld [vmem:[%s4924_s5] sm:$0xff]  ;;  %vm600_vm3 = vcmask 1043456   ;;  %vm4009_vm10 = vmmov 0  }
  0x2e   : > { %372 = vst [vmem:[#allocation3 + $0x38] sm:$0xf] %v3267_v4  ;;  %3408 = vmatprep.mubr.msk.bf16.mxu1 %vm593_vm0, %v4152_v5  ;;  %3624 = vset.pattern.permute.xlu0 %v4006_v6  ;;  %vm404_vm1 = vcmp.lt.s32.totalorder %v4178_v13, 111  ;;  %vm454_vm2 = vcmp.lt.s32.totalorder %v4178_v13, 109  ;;  %vm429_vm4 = vcmp.lt.s32.totalorder %v4178_v13, 110  ;;  %vm379_vm5 = vcmp.lt.s32.totalorder %v4178_v13, 127 }
  0x2f   : > { %vm314_vm6 = vcmp.lt.s32.totalorder %v4178_v13, 17  ;;  %vm339_vm7 = vcmp.lt.s32.totalorder %v4178_v13, 1  ;;  %vm264_vm8 = vcmp.lt.s32.totalorder %v4178_v13, 19  ;;  %vm289_vm9 = vcmp.lt.s32.totalorder %v4178_v13, 18  ;;  %s4939_s8 = smov 17   ;;  %s4940_s12 = smov 1  }
  0x30   : > { %vm735_vm11 = vcmask 261120   ;;  %s4941_s20 = smov 19   ;;  %s4942_s27 = smov 18  }
  0x31   : > { %402 = vrot.lane.b32.xlu1 %v4126_v3, %s3999_s29  ;;  %452 = vrot.lane.b32.xlu0 %v4126_v3, %s4000_s14 }
  0x35   : > { %3595 = vrot.lane.b32.xlu0 %v3589_v2, %s4001_s15  ;;  %427 = vrot.lane.b32.xlu1 %v4126_v3, %s4001_s15 }
  0x39   : > { %3600 = vrot.lane.b32.xlu0 %v3589_v2, %s4002_s16  ;;  %377 = vrot.lane.b32.xlu1 %v4126_v3, %s4002_s16 }
  0x3d   : > { %3605 = vrot.lane.b32.xlu0 %v3589_v2, %s4934_s17  ;;  %312 = vrot.lane.b32.xlu1 %v4126_v3, %s4934_s17 }
  0x41   : > { %3610 = vrot.lane.b32.xlu0 %v3589_v2, %s4930_s18  ;;  %337 = vrot.lane.b32.xlu1 %v4126_v3, %s4930_s18 }
  0x45   : > { %3615 = vrot.lane.b32.xlu0 %v3589_v2, %s4928_s19  ;;  %260 = vrot.lane.b32.xlu1 %v4126_v3, %s4928_s19 }
  0x49   : > { %3620 = vrot.lane.b32.xlu0 %v3589_v2, %s4932_s28  ;;  %287 = vrot.lane.b32.xlu1 %v4126_v3, %s4932_s28 }
  0x4d   : > { %508 = vperm.xlu1 %3625, %v249_v7   ;;  %503 = vperm.xlu0 %3624, %v248_v8  }
  0x51   : > { %493 = vperm.xlu1 %3625, %v246_v9   ;;  %498 = vperm.xlu0 %3624, %v247_v10  }
  0x55   : > { %732 = vperm.xlu1 %3625, %v251_v11  }
  0x9f   : > { %v3591_v14 = vpop.permute.xlu1 %3590  ;;  %v3586_v15 = vpop.permute.xlu0 %3585 }
  0xa0   : > { %v3592_v16 = vunpack.i.l.bf16 %v3591_v14  ;;  %v3588_v17 = vunpack.i.h.bf16 %v3586_v15  ;;  %v3587_v18 = vunpack.i.l.bf16 %v3586_v15  ;;  %v3593_v19 = vunpack.i.h.bf16 %v3591_v14 }
  0xa2   : > { %v456_v24 = vsel %vm454_vm2, %v3587_v18, %v3588_v17  ;;  %v406_v33 = vsel %vm404_vm1, %v3592_v16, %v3593_v19 }
  0xa3   : > { %v403_v20 = vpop.permute.xlu1 %402  ;;  %v453_v21 = vpop.permute.xlu0 %452  ;;  %v3847_v31 = vpack.c.bf16 %v456_v24, %v456_v24 }
  0xa4   : > { %v407_v22 = vsel %vm404_vm1, %v403_v20, %v3592_v16  ;;  %v455_v23 = vsel %vm454_vm2, %v3588_v17, %v453_v21  ;;  %v457_v25 = vsel %vm454_vm2, %v453_v21, %v3587_v18  ;;  %v405_v32 = vsel %vm404_vm1, %v3593_v19, %v403_v20 }
  0xa5   : > { %v3271_v26 = vpack.c.bf16 %v407_v22, %v407_v22  ;;  %v3275_v27 = vpack.c.bf16 %v457_v25, %v457_v25  ;;  %v3846_v30 = vpack.c.bf16 %v455_v23, %v455_v23  ;;  %v602_v36 = vsel %vm600_vm3, %v3847_v31, 0 }
  0xa7   : > { %422 = vst [vmem:[#allocation3 + $0x50] sm:$0xf] %v3271_v26  ;;  %472 = vst [vmem:[#allocation3 + $0x68] sm:$0xf] %v3275_v27  ;;  %v3596_v28 = vpop.permute.xlu0 %3595  ;;  %v428_v29 = vpop.permute.xlu1 %427  ;;  %3075 = vmatprep.subr.msk.bf16.mxu0 %vm600_vm3, %v3846_v30 }
  0xa8   : > { %v3598_v34 = vunpack.i.h.bf16 %v3596_v28  ;;  %v3597_v35 = vunpack.i.l.bf16 %v3596_v28  ;;  %617 = vmatpush1.bf16.msra.mxu0 %v602_v36 }
  0xaa   : > { %v430_v37 = vsel %vm429_vm4, %v3598_v34, %v428_v29  ;;  %v431_v38 = vsel %vm429_vm4, %v3597_v35, %v3598_v34  ;;  %v432_v39 = vsel %vm429_vm4, %v428_v29, %v3597_v35 }
  0xab   : > { %v3273_v40 = vpack.c.bf16 %v432_v39, %v432_v39  ;;  %v3601_v41 = vpop.permute.xlu0 %3600  ;;  %v378_v42 = vpop.permute.xlu1 %377  ;;  %v3848_v45 = vpack.c.bf16 %v430_v37, %v405_v32  ;;  %v3849_v46 = vpack.c.bf16 %v431_v38, %v406_v33  ;;  %v4248_v38 = vld [vmem:[%s4921_s2 + $0x8] sm:$0xff]   ;;  %v4008_v39 = vmov 0.0  }
  0xac   : > { %v3603_v43 = vunpack.i.h.bf16 %v3601_v41  ;;  %v3602_v44 = vunpack.i.l.bf16 %v3601_v41 }
  0xad   : > { %447 = vst [vmem:[#allocation3 + $0x5c] sm:$0xf] %v3273_v40  ;;  %618 = vmatprep.subr.bf16.mxu0 %v3848_v45 }
  0xae   : > { %v380_v47 = vsel %vm379_vm5, %v3603_v43, %v378_v42  ;;  %v381_v48 = vsel %vm379_vm5, %v3602_v44, %v3603_v43  ;;  %v382_v49 = vsel %vm379_vm5, %v378_v42, %v3602_v44  ;;  %v3786_v50 = vld [vmem:[#allocation3 + $0x68] ss:$0 sps:$4 sm:$0xff]   ;;  %619 = vmatpush1.bf16.msra.mxu0 %v3849_v46 }
  0xaf   : > { %v3269_v51 = vpack.c.bf16 %v382_v49, %v382_v49  ;;  %v3606_v52 = vpop.permute.xlu0 %3605  ;;  %v313_v53 = vpop.permute.xlu1 %312  ;;  %3508 = vmatprep.subr.msk.bf16.mxu1 %vm600_vm3, %v3786_v50  ;;  %v608_v56 = vsel %vm600_vm3, %v3786_v50, 0  ;;  %v3850_v57 = vpack.c.bf16 %v380_v47, %v4120_v1  ;;  %v3851_v58 = vpack.c.bf16 %v381_v48, %v4118_v0 }
  0xb0   : > { %v3608_v54 = vunpack.i.h.bf16 %v3606_v52  ;;  %v3607_v55 = vunpack.i.l.bf16 %v3606_v52  ;;  %3399 = vmatpush3.bf16.msra.mxu1 %v608_v56 }
  0xb1   : > { %397 = vst [vmem:[#allocation3 + $0x44] sm:$0xf] %v3269_v51  ;;  %620 = vmatprep.subr.bf16.mxu0 %v3850_v57 }
  0xb2   : > { %v315_v59 = vsel %vm314_vm6, %v3608_v54, %v313_v53  ;;  %v316_v63 = vsel %vm314_vm6, %v3607_v55, %v3608_v54  ;;  %v317_v2 = vsel %vm314_vm6, %v313_v53, %v3607_v55  ;;  %621 = vmatpush1.bf16.msra.mxu0 %v3851_v58 }
  0xb3   : > { %v3263_v60 = vpack.c.bf16 %v315_v59, %v315_v59  ;;  %v3611_v61 = vpop.permute.xlu0 %3610  ;;  %v338_v62 = vpop.permute.xlu1 %337 }
  0xb4   : > { %v3613_v4 = vunpack.i.h.bf16 %v3611_v61  ;;  %v3612_v7 = vunpack.i.l.bf16 %v3611_v61  ;;  %v3787_v8 = vld [vmem:[#allocation3 + $0x50] ss:$12 sps:$4 sm:$0xff]  }
  0xb5   : > { %332 = vst [vmem:[#allocation3 + $0x20] sm:$0xf] %v3263_v60  ;;  %3400 = vmatprep.subr.bf16.mxu1 %v3787_v8 }
  0xb6   : > { %v340_v9 = vsel %vm339_vm7, %v3613_v4, %v338_v62  ;;  %v341_v10 = vsel %vm339_vm7, %v3612_v7, %v3613_v4  ;;  %v342_v11 = vsel %vm339_vm7, %v338_v62, %v3612_v7  ;;  %3401 = vmatpush3.bf16.msra.mxu1 %v3787_v8 }
  0xb7   : > { %v3265_v14 = vpack.c.bf16 %v340_v9, %v340_v9  ;;  %v3616_v15 = vpop.permute.xlu0 %3615  ;;  %v261_v16 = vpop.permute.xlu1 %260  ;;  %v3852_v20 = vpack.c.bf16 %v341_v10, %v316_v63  ;;  %v3853_v21 = vpack.c.bf16 %v342_v11, %v317_v2 }
  0xb8   : > { %v3618_v17 = vunpack.i.h.bf16 %v3616_v15  ;;  %v3617_v18 = vunpack.i.l.bf16 %v3616_v15  ;;  %v3788_v19 = vld [vmem:[#allocation3 + $0x38] ss:$12 sps:$4 sm:$0xff]  }
  0xb9   : > { %357 = vst [vmem:[#allocation3 + $0x2c] sm:$0xf] %v3265_v14  ;;  %3402 = vmatprep.subr.bf16.mxu1 %v3788_v19  ;;  %622 = vmatprep.subr.bf16.mxu0 %v3852_v20 }
  0xba   : > { %v265_v22 = vsel %vm264_vm8, %v3618_v17, %v261_v16  ;;  %3403 = vmatpush3.bf16.msra.mxu1 %v3788_v19  ;;  %v266_v26 = vsel %vm264_vm8, %v3617_v18, %v3618_v17  ;;  %v267_v27 = vsel %vm264_vm8, %v261_v16, %v3617_v18  ;;  %623 = vmatpush1.bf16.msra.mxu0 %v3853_v21 }
  0xbb   : > { %v3259_v23 = vpack.c.bf16 %v265_v22, %v265_v22  ;;  %v3621_v24 = vpop.permute.xlu0 %3620  ;;  %v288_v25 = vpop.permute.xlu1 %287 }
  0xbc   : > { %v3623_v28 = vunpack.i.h.bf16 %v3621_v24  ;;  %v3622_v29 = vunpack.i.l.bf16 %v3621_v24 }
  0xbd   : > { %282 = vst [vmem:[#allocation3 + $0x8] sm:$0xf] %v3259_v23 }
  0xbe   : > { %v290_v30 = vsel %vm289_vm9, %v3623_v28, %v288_v25  ;;  %v291_v31 = vsel %vm289_vm9, %v3622_v29, %v3623_v28  ;;  %v292_v32 = vsel %vm289_vm9, %v288_v25, %v3622_v29  ;;  %v4282_v28 = vld [vmem:[%s4923_s4] sm:$0xf] }
  0xbf   : > { %v3261_v33 = vpack.c.bf16 %v290_v30, %v290_v30  ;;  %v3854_v35 = vpack.c.bf16 %v291_v31, %v266_v26  ;;  %v3855_v36 = vpack.c.bf16 %v292_v32, %v267_v27 }
  0xc0   : > { %v3789_v34 = vld [vmem:[#allocation3 + $0x20] ss:$12 sps:$4 sm:$0xff]  }
  0xc1   : > { %307 = vst [vmem:[#allocation3 + $0x14] sm:$0xf] %v3261_v33  ;;  %3404 = vmatprep.subr.bf16.mxu1 %v3789_v34  ;;  %624 = vmatprep.subr.bf16.mxu0 %v3854_v35 }
  0xc2   : > { %3405 = vmatpush3.bf16.msra.mxu1 %v3789_v34  ;;  %625 = vmatpush1.bf16.msra.mxu0 %v3855_v36 }
  0xc3   : > { %3412 = vmatprep.subr.bf16.mxu0 %v4008_v39 }
  0xc5   : > { %3076 = vmatmul.mubr.msk.bf16.vlgmr.msra.gmra.mxu0 %vm593_vm0, %v4152_v5 }
  0xc6   : > { %652 = vmatprep.mubr.bf16.mxu0 %v4006_v6 }
  0xc8   : > { %v3790_v37 = vld [vmem:[#allocation3 + $0x8] ss:$12 sps:$4 sm:$0xff]   ;;  %v4258_v42 = vpop.permute.xlu1 %508  ;;  %v4260_v44 = vpop.permute.xlu0 %503 }
  0xc9   : > { %3406 = vmatprep.subr.bf16.mxu1 %v3790_v37 }
  0xca   : > { %3407 = vmatpush3.bf16.msra.mxu1 %v3790_v37 }
  0xcc   : > { %v4263_v49 = vpop.permute.xlu1 %493  ;;  %v4266_v55 = vpop.permute.xlu0 %498 }
  0xcd   : > { %3409 = vmatmul.mubr.msk.bf16.vlgmr.msra.gmra.mxu1 %vm593_vm0, %v4248_v38  ;;  %3077 = vmatmul.mubr.msk.bf16.gmra.mxu0 %vm593_vm0, %v4248_v38 }
  0xce   : > { %771 = vmatprep.mubr.bf16.mxu1 %v4006_v6  ;;  %3416 = vmatprep.mubr.msk.bf16.mxu0 %vm4009_vm10, %v4008_v39 }
  0xd0   : > { %v4291_v30 = vpop.permute.xlu1 %732 }
 0x185   : > { %v644_v40 = vpop.f32.mrf.mxu0 }
 0x186   : > { %v645_v19 = vadd.f32 %v644_v40, %v4263_v49 }
 0x187   : > { %v646_v41 = vpop.f32.mrf.mxu0 }
 0x188   : > { %v647_v8 = vadd.f32 %v646_v41, %v4263_v49  ;;  %v712_v27 = vmax.f32 %v645_v19, 0.0  ;;  %v828_v41 = vshrl.u32 %v262_v12, 7 }
 0x189   : > { %v648_v43 = vpop.f32.mrf.mxu0 }
 0x18a   : > { %v649_v10 = vadd.f32 %v648_v43, %v4266_v55  ;;  %v713_v22 = vmax.f32 %v647_v8, 0.0  ;;  %v833_v12 = vsub.s32 1, %v828_v41 }
 0x18b   : > { %v650_v45 = vpop.f32.mrf.mxu0 }
 0x18c   : > { %v651_v58 = vadd.f32 %v650_v45, %v4266_v55  ;;  %v715_v24 = vmax.f32 %v649_v10, 0.0 }
 0x18d   : > { %v3410_v46 = vpop.f32.mrf.mxu1  ;;  %v654_v48 = vpop.f32.mrf.mxu0 }
 0x18e   : > { %v706_v47 = vadd.f32 %v3410_v46, %v4260_v44  ;;  %v655_v2 = vadd.f32 %v654_v48, %v4260_v44  ;;  %v716_v16 = vmax.f32 %v651_v58, 0.0  ;;  %v724_v29 = vpack.c.bf16 %v715_v24, %v712_v27  ;;  %v252_v48 = vld [vmem:[%s4920_s1] sm:$0x7] }
 0x18f   : > { %v697_v50 = vpop.f32.mrf.mxu1  ;;  %v656_v52 = vpop.f32.mrf.mxu0 }
 0x190   : > { %v698_v51 = vadd.f32 %v697_v50, %v4263_v49  ;;  %v720_v54 = vmax.f32 %v706_v47, 0.0  ;;  %v657_v60 = vadd.f32 %v656_v52, %v4260_v44  ;;  %v718_v20 = vmax.f32 %v655_v2, 0.0 }
 0x191   : > { %v3411_v53 = vpop.f32.mrf.mxu1  ;;  %v658_v57 = vpop.f32.mrf.mxu0  ;;  %v725_v26 = vpack.c.bf16 %v716_v16, %v713_v22  ;;  %v837_v47 = vsub.s32 2, %v828_v41 }
 0x192   : > { %v709_v56 = vadd.f32 %v3411_v53, %v4258_v42  ;;  %v659_v61 = vadd.f32 %v658_v57, %v4258_v42  ;;  %v714_v62 = vmax.f32 %v698_v51, 0.0  ;;  %v719_v17 = vmax.f32 %v657_v60, 0.0 }
 0x193   : > { %v700_v59 = vpop.f32.mrf.mxu1  ;;  %v660_v7 = vpop.f32.mrf.mxu0  ;;  %v4300_v50 = vrot.slane %v252_v48, %v837_v47  ;;  %v829_v51 = vsub.s32 0, %v828_v41 }
 0x194   : > { %v723_v63 = vmax.f32 %v709_v56, 0.0  ;;  %v701_v4 = vadd.f32 %v700_v59, %v4266_v55  ;;  %v661_v9 = vadd.f32 %v660_v7, %v4258_v42  ;;  %v721_v15 = vmax.f32 %v659_v61, 0.0 }
 0x195   : > { %v4306_v56 = vrot.slane %v252_v48, %v829_v51  ;;  %v4311_v59 = vrot.slane %v252_v48, %v833_v12 }
 0x196   : > { %v729_v11 = vpack.c.bf16 %v723_v63, %v720_v54  ;;  %v717_v14 = vmax.f32 %v701_v4, 0.0  ;;  %v722_v18 = vmax.f32 %v661_v9, 0.0  ;;  %v727_v25 = vpack.c.bf16 %v721_v15, %v718_v20 }
 0x198   : > { %v726_v21 = vpack.c.bf16 %v717_v14, %v714_v62  ;;  %3413 = vmatpush3.bf16.msra.mxu0 %v729_v11  ;;  %v728_v23 = vpack.c.bf16 %v722_v18, %v719_v17 }
 0x199   : > { %3414 = vmatprep.subr.bf16.mxu0 %v4008_v39 }
 0x19a   : > { %751 = vmatprep.subr.bf16.mxu1 %v728_v23 }
 0x19b   : > { %752 = vmatpush1.bf16.msra.mxu1 %v727_v25 }
 0x19c   : > { %3415 = vmatpush3.bf16.msra.mxu0 %v726_v21  ;;  %753 = vmatprep.subr.bf16.mxu1 %v725_v26 }
 0x19f   : > { %3417 = vmatmul.mubr.msk.bf16.vlgmr.msra.gmra.mxu0 %vm735_vm11, %v4282_v28  ;;  %754 = vmatpush1.bf16.msra.mxu1 %v724_v29 }
 0x1a0   : > { %3430 = vmatprep.mubr.msk.bf16.mxu0 %vm593_vm0, %v4152_v5 }
 0x1a2   : > { %3080 = vmatmul.mubr.msk.bf16.vlgmr.msra.gmra.mxu1 %vm735_vm11, %v4282_v28 }
 0x1a3   : > { %1192 = vmatprep.mubr.bf16.mxu1 %v4006_v6 }
 0x25f   : > { %v814_v31 = vpop.f32.mrf.mxu0 }
 0x260   : > { %v815_v32 = vadd.f32 %v814_v31, %v4291_v30 }
 0x261   : > { %v3418_v33 = vpop.f32.mrf.mxu0 }
 0x262   : > { %3813 = vtanh.f32 %v815_v32  ;;  %v773_v34 = vpop.f32.mrf.mxu1 }
 0x263   : > { %v817_v35 = vpop.f32.mrf.mxu0  ;;  %v774_v36 = vadd.f32 %v773_v34, %v4291_v30 }
 0x264   : > { %v775_v37 = vpop.f32.mrf.mxu1 }
 0x265   : > { %v3419_v40 = vpop.f32.mrf.mxu0  ;;  %3815 = vtanh.f32 %v774_v36  ;;  %v776_v43 = vadd.f32 %v775_v37, %v4291_v30 }
 0x266   : > { %v777_v45 = vpop.f32.mrf.mxu1 }
 0x267   : > { %3817 = vtanh.f32 %v776_v43 }
 0x268   : > { %v778_v46 = vpop.f32.mrf.mxu1 }
 0x26f   : > { %v3814_v52 = vpop.eup %3813 }
 0x270   : > { %v825_v53 = vadd.f32 %v3814_v52, %v4126_v3 }
 0x272   : > { %v4304_v54 = vmul.f32 %v4300_v50, %v825_v53  ;;  %v3816_v57 = vpop.eup %3815 }
 0x273   : > { %v823_v58 = vadd.f32 %v3816_v57, %v4118_v0 }
 0x274   : > { %850 = vst [vmem:[%s4106_s13 + $0x10] sm:$0xff] %v4304_v54  ;;  %1041 = vrot.lane.b32.xlu1 %v4304_v54, %s4000_s14  ;;  %v3285_v3 = vpack.c.bf16 %v4304_v54, %v4304_v54  ;;  %v3818_v60 = vpop.eup %3817 }
 0x275   : > { %v4318_v61 = vmul.f32 %v4306_v56, %v823_v58  ;;  %v824_v62 = vadd.f32 %v3818_v60, %v4120_v1 }
 0x276   : > { %964 = vst [vmem:[#allocation3 + $0x38] sm:$0xf] %v3285_v3 }
 0x277   : > { %848 = vst [vmem:[%s4106_s13] sm:$0xff] %v4318_v61  ;;  %v4324_v63 = vmul.f32 %v4311_v59, %v824_v62 }
 0x278   : > { %993 = vrot.lane.b32.xlu1 %v4304_v54, %s3999_s29 }
 0x279   : > { %849 = vst [vmem:[%s4106_s13 + $0x8] sm:$0xff] %v4324_v63  ;;  %v3626_v0 = vpack.i.bf16 %v4324_v63, %v4318_v61 }
 0x27b   : > { %3627 = vrot.lane.b32.xlu0 %v3626_v0, %s4000_s14 }
 0x27c   : > { %1017 = vrot.lane.b32.xlu1 %v4304_v54, %s4001_s15 }
 0x27f   : > { %3632 = vrot.lane.b32.xlu0 %v3626_v0, %s3999_s29 }
 0x280   : > { %969 = vrot.lane.b32.xlu1 %v4304_v54, %s4002_s16 }
 0x283   : > { %3637 = vrot.lane.b32.xlu0 %v3626_v0, %s4001_s15 }
 0x284   : > { %906 = vrot.lane.b32.xlu1 %v4304_v54, %s4939_s8 }
 0x287   : > { %3642 = vrot.lane.b32.xlu0 %v3626_v0, %s4002_s16 }
 0x288   : > { %930 = vrot.lane.b32.xlu1 %v4304_v54, %s4940_s12 }
 0x28b   : > { %3647 = vrot.lane.b32.xlu0 %v3626_v0, %s4939_s8 }
 0x28c   : > { %858 = vrot.lane.b32.xlu1 %v4304_v54, %s4941_s20 }
 0x28f   : > { %3652 = vrot.lane.b32.xlu0 %v3626_v0, %s4940_s12 }
 0x290   : > { %882 = vrot.lane.b32.xlu1 %v4304_v54, %s4942_s27 }
 0x293   : > { %3657 = vrot.lane.b32.xlu0 %v3626_v0, %s4941_s20 }
 0x297   : > { %3662 = vrot.lane.b32.xlu0 %v3626_v0, %s4942_s27 }
 0x2e6   : > { %v1042_v1 = vpop.permute.xlu1 %1041 }
 0x2ea   : > { %v994_v2 = vpop.permute.xlu1 %993 }
 0x2ed   : > { %v3628_v7 = vpop.permute.xlu0 %3627 }
 0x2ee   : > { %v1018_v4 = vpop.permute.xlu1 %1017  ;;  %v3630_v8 = vunpack.i.h.bf16 %v3628_v7  ;;  %v3629_v9 = vunpack.i.l.bf16 %v3628_v7 }
 0x2f0   : > { %v1043_v10 = vsel %vm454_vm2, %v3630_v8, %v1042_v1  ;;  %v1044_v11 = vsel %vm454_vm2, %v3629_v9, %v3630_v8  ;;  %v1045_v14 = vsel %vm454_vm2, %v1042_v1, %v3629_v9 }
 0x2f1   : > { %v3293_v15 = vpack.c.bf16 %v1045_v14, %v1045_v14  ;;  %v3633_v16 = vpop.permute.xlu0 %3632  ;;  %v3856_v20 = vpack.c.bf16 %v1043_v10, %v1043_v10  ;;  %v3857_v21 = vpack.c.bf16 %v1044_v11, %v1044_v11 }
 0x2f2   : > { %v3635_v17 = vunpack.i.h.bf16 %v3633_v16  ;;  %v3634_v18 = vunpack.i.l.bf16 %v3633_v16  ;;  %v970_v19 = vpop.permute.xlu1 %969 }
 0x2f3   : > { %1060 = vst [vmem:[#allocation3 + $0x68] sm:$0xf] %v3293_v15  ;;  %3115 = vmatprep.subr.msk.bf16.mxu1 %vm600_vm3, %v3856_v20  ;;  %v1152_v25 = vsel %vm600_vm3, %v3857_v21, 0 }
 0x2f4   : > { %v997_v22 = vsel %vm404_vm1, %v994_v2, %v3634_v18  ;;  %v995_v26 = vsel %vm404_vm1, %v3635_v17, %v994_v2  ;;  %v996_v27 = vsel %vm404_vm1, %v3634_v18, %v3635_v17  ;;  %1167 = vmatpush1.bf16.msra.mxu1 %v1152_v25 }
 0x2f5   : > { %v3289_v23 = vpack.c.bf16 %v997_v22, %v997_v22  ;;  %v3638_v24 = vpop.permute.xlu0 %3637 }
 0x2f6   : > { %v3640_v29 = vunpack.i.h.bf16 %v3638_v24  ;;  %v3639_v31 = vunpack.i.l.bf16 %v3638_v24  ;;  %v907_v35 = vpop.permute.xlu1 %906 }
 0x2f7   : > { %1012 = vst [vmem:[#allocation3 + $0x50] sm:$0xf] %v3289_v23 }
 0x2f8   : > { %v1019_v32 = vsel %vm429_vm4, %v3640_v29, %v1018_v4  ;;  %v1020_v33 = vsel %vm429_vm4, %v3639_v31, %v3640_v29  ;;  %v1021_v34 = vsel %vm429_vm4, %v1018_v4, %v3639_v31 }
 0x2f9   : > { %v3291_v36 = vpack.c.bf16 %v1021_v34, %v1021_v34  ;;  %v3643_v37 = vpop.permute.xlu0 %3642  ;;  %v3858_v45 = vpack.c.bf16 %v1019_v32, %v995_v26  ;;  %v3859_v46 = vpack.c.bf16 %v1020_v33, %v996_v27 }
 0x2fa   : > { %v3645_v40 = vunpack.i.h.bf16 %v3643_v37  ;;  %v3644_v41 = vunpack.i.l.bf16 %v3643_v37  ;;  %v3793_v43 = vld [vmem:[#allocation3 + $0x68] ss:$0 sps:$4 sm:$0xff]   ;;  %v931_v3 = vpop.permute.xlu1 %930 }
 0x2fb   : > { %1036 = vst [vmem:[#allocation3 + $0x5c] sm:$0xf] %v3291_v36  ;;  %3509 = vmatprep.subr.msk.bf16.mxu0 %vm600_vm3, %v3793_v43  ;;  %v1158_v52 = vsel %vm600_vm3, %v3793_v43, 0  ;;  %1168 = vmatprep.subr.bf16.mxu1 %v3858_v45 }
 0x2fc   : > { %v971_v47 = vsel %vm379_vm5, %v3645_v40, %v970_v19  ;;  %v972_v48 = vsel %vm379_vm5, %v3644_v41, %v3645_v40  ;;  %v973_v51 = vsel %vm379_vm5, %v970_v19, %v3644_v41  ;;  %3421 = vmatpush3.bf16.msra.mxu0 %v1158_v52  ;;  %1169 = vmatpush1.bf16.msra.mxu1 %v3859_v46 }
 0x2fd   : > { %v3287_v53 = vpack.c.bf16 %v973_v51, %v973_v51  ;;  %v3648_v12 = vpop.permute.xlu0 %3647  ;;  %v3860_v60 = vpack.c.bf16 %v971_v47, %v4324_v63  ;;  %v3861_v62 = vpack.c.bf16 %v972_v48, %v4318_v61 }
 0x2fe   : > { %v3650_v57 = vunpack.i.h.bf16 %v3648_v12  ;;  %v3649_v58 = vunpack.i.l.bf16 %v3648_v12  ;;  %v859_v16 = vpop.permute.xlu1 %858 }
 0x2ff   : > { %988 = vst [vmem:[#allocation3 + $0x44] sm:$0xf] %v3287_v53  ;;  %1170 = vmatprep.subr.bf16.mxu1 %v3860_v60 }
 0x300   : > { %v908_v0 = vsel %vm314_vm6, %v3650_v57, %v907_v35  ;;  %v909_v4 = vsel %vm314_vm6, %v3649_v58, %v3650_v57  ;;  %v910_v7 = vsel %vm314_vm6, %v907_v35, %v3649_v58  ;;  %1171 = vmatpush1.bf16.msra.mxu1 %v3861_v62 }
 0x301   : > { %v3281_v1 = vpack.c.bf16 %v908_v0, %v908_v0  ;;  %v3653_v2 = vpop.permute.xlu0 %3652 }
 0x302   : > { %v3655_v8 = vunpack.i.h.bf16 %v3653_v2  ;;  %v3654_v9 = vunpack.i.l.bf16 %v3653_v2  ;;  %v3794_v10 = vld [vmem:[#allocation3 + $0x50] ss:$12 sps:$4 sm:$0xff]   ;;  %v883_v33 = vpop.permute.xlu1 %882 }
 0x303   : > { %925 = vst [vmem:[#allocation3 + $0x20] sm:$0xf] %v3281_v1  ;;  %3422 = vmatprep.subr.bf16.mxu0 %v3794_v10 }
 0x304   : > { %v932_v11 = vsel %vm339_vm7, %v3655_v8, %v931_v3  ;;  %v933_v14 = vsel %vm339_vm7, %v3654_v9, %v3655_v8  ;;  %v934_v15 = vsel %vm339_vm7, %v931_v3, %v3654_v9  ;;  %3423 = vmatpush3.bf16.msra.mxu0 %v3794_v10 }
 0x305   : > { %v3283_v17 = vpack.c.bf16 %v932_v11, %v932_v11  ;;  %v3658_v18 = vpop.permute.xlu0 %3657  ;;  %v3862_v22 = vpack.c.bf16 %v933_v14, %v909_v4  ;;  %v3863_v23 = vpack.c.bf16 %v934_v15, %v910_v7 }
 0x306   : > { %v3660_v19 = vunpack.i.h.bf16 %v3658_v18  ;;  %v3659_v20 = vunpack.i.l.bf16 %v3658_v18  ;;  %v3795_v21 = vld [vmem:[#allocation3 + $0x38] ss:$12 sps:$4 sm:$0xff]  }
 0x307   : > { %949 = vst [vmem:[#allocation3 + $0x2c] sm:$0xf] %v3283_v17  ;;  %3424 = vmatprep.subr.bf16.mxu0 %v3795_v21  ;;  %1172 = vmatprep.subr.bf16.mxu1 %v3862_v22 }
 0x308   : > { %v860_v24 = vsel %vm264_vm8, %v3660_v19, %v859_v16  ;;  %3425 = vmatpush3.bf16.msra.mxu0 %v3795_v21  ;;  %v861_v27 = vsel %vm264_vm8, %v3659_v20, %v3660_v19  ;;  %v862_v29 = vsel %vm264_vm8, %v859_v16, %v3659_v20  ;;  %1173 = vmatpush1.bf16.msra.mxu1 %v3863_v23 }
 0x309   : > { %v3277_v25 = vpack.c.bf16 %v860_v24, %v860_v24  ;;  %v3663_v26 = vpop.permute.xlu0 %3662 }
 0x30a   : > { %v3665_v31 = vunpack.i.h.bf16 %v3663_v26  ;;  %v3664_v32 = vunpack.i.l.bf16 %v3663_v26 }
 0x30b   : > { %877 = vst [vmem:[#allocation3 + $0x8] sm:$0xf] %v3277_v25 }
 0x30c   : > { %v884_v34 = vsel %vm289_vm9, %v3665_v31, %v883_v33  ;;  %v885_v35 = vsel %vm289_vm9, %v3664_v32, %v3665_v31  ;;  %v886_v36 = vsel %vm289_vm9, %v883_v33, %v3664_v32 }
 0x30d   : > { %v3279_v37 = vpack.c.bf16 %v884_v34, %v884_v34  ;;  %v3864_v41 = vpack.c.bf16 %v885_v35, %v861_v27  ;;  %v3865_v43 = vpack.c.bf16 %v886_v36, %v862_v29 }
 0x30e   : > { %v3796_v40 = vld [vmem:[#allocation3 + $0x20] ss:$12 sps:$4 sm:$0xff]  }
 0x30f   : > { %901 = vst [vmem:[#allocation3 + $0x14] sm:$0xf] %v3279_v37  ;;  %3426 = vmatprep.subr.bf16.mxu0 %v3796_v40  ;;  %1174 = vmatprep.subr.bf16.mxu1 %v3864_v41 }
 0x310   : > { %3427 = vmatpush3.bf16.msra.mxu0 %v3796_v40  ;;  %1175 = vmatpush1.bf16.msra.mxu1 %v3865_v43 }
 0x311   : > { %3434 = vmatprep.subr.bf16.mxu1 %v4008_v39 }
 0x313   : > { %3116 = vmatmul.mubr.msk.bf16.vlgmr.msra.gmra.mxu1 %vm593_vm0, %v4152_v5 }
 0x314   : > { %1202 = vmatprep.mubr.bf16.mxu1 %v4006_v6 }
 0x316   : > { %v3797_v45 = vld [vmem:[#allocation3 + $0x8] ss:$12 sps:$4 sm:$0xff]  }
 0x317   : > { %3428 = vmatprep.subr.bf16.mxu0 %v3797_v45 }
 0x318   : > { %3429 = vmatpush3.bf16.msra.mxu0 %v3797_v45 }
 0x31b   : > { %3431 = vmatmul.mubr.msk.bf16.vlgmr.msra.gmra.mxu0 %vm593_vm0, %v4248_v38  ;;  %3117 = vmatmul.mubr.msk.bf16.gmra.mxu1 %vm593_vm0, %v4248_v38 }
 0x31c   : > { %1312 = vmatprep.mubr.bf16.mxu0 %v4006_v6  ;;  %3438 = vmatprep.mubr.msk.bf16.mxu1 %vm4009_vm10, %v4008_v39 }
 0x3d3   : > { %v1194_v46 = vpop.f32.mrf.mxu1 }
 0x3d4   : > { %v1195_v24 = vadd.f32 %v1194_v46, %v4263_v49 }
 0x3d5   : > { %v1196_v47 = vpop.f32.mrf.mxu1 }
 0x3d6   : > { %v1197_v15 = vadd.f32 %v1196_v47, %v4263_v49  ;;  %v1262_v35 = vmax.f32 %v1195_v24, 0.0 }
 0x3d7   : > { %v1198_v48 = vpop.f32.mrf.mxu1 }
 0x3d8   : > { %v1199_v17 = vadd.f32 %v1198_v48, %v4266_v55  ;;  %v1263_v27 = vmax.f32 %v1197_v15, 0.0 }
 0x3d9   : > { %v1200_v51 = vpop.f32.mrf.mxu1 }
 0x3da   : > { %v1201_v0 = vadd.f32 %v1200_v51, %v4266_v55  ;;  %v1265_v31 = vmax.f32 %v1199_v17, 0.0 }
 0x3db   : > { %v3432_v52 = vpop.f32.mrf.mxu0  ;;  %v1204_v53 = vpop.f32.mrf.mxu1 }
 0x3dc   : > { %v1256_v57 = vadd.f32 %v3432_v52, %v4260_v44  ;;  %v1205_v2 = vadd.f32 %v1204_v53, %v4260_v44  ;;  %v1266_v21 = vmax.f32 %v1201_v0, 0.0  ;;  %v1274_v36 = vpack.c.bf16 %v1265_v31, %v1262_v35 }
 0x3dd   : > { %v1247_v12 = vpop.f32.mrf.mxu0  ;;  %v1206_v58 = vpop.f32.mrf.mxu1 }
 0x3de   : > { %v1207_v4 = vadd.f32 %v1206_v58, %v4260_v44  ;;  %v1270_v8 = vmax.f32 %v1256_v57, 0.0  ;;  %v1248_v9 = vadd.f32 %v1247_v12, %v4263_v49  ;;  %v1268_v26 = vmax.f32 %v1205_v2, 0.0 }
 0x3df   : > { %v3433_v3 = vpop.f32.mrf.mxu0  ;;  %v1208_v62 = vpop.f32.mrf.mxu1  ;;  %v1275_v34 = vpack.c.bf16 %v1266_v21, %v1263_v27 }
 0x3e0   : > { %v1259_v60 = vadd.f32 %v3433_v3, %v4258_v42  ;;  %v1209_v7 = vadd.f32 %v1208_v62, %v4258_v42  ;;  %v1269_v22 = vmax.f32 %v1207_v4, 0.0  ;;  %v1264_v25 = vmax.f32 %v1248_v9, 0.0 }
 0x3e1   : > { %v1250_v1 = vpop.f32.mrf.mxu0  ;;  %v1210_v14 = vpop.f32.mrf.mxu1 }
 0x3e2   : > { %v1273_v10 = vmax.f32 %v1259_v60, 0.0  ;;  %v1251_v11 = vadd.f32 %v1250_v1, %v4266_v55  ;;  %v1211_v16 = vadd.f32 %v1210_v14, %v4258_v42  ;;  %v1271_v20 = vmax.f32 %v1209_v7, 0.0 }
 0x3e4   : > { %v1279_v18 = vpack.c.bf16 %v1273_v10, %v1270_v8  ;;  %v1267_v19 = vmax.f32 %v1251_v11, 0.0  ;;  %v1272_v23 = vmax.f32 %v1211_v16, 0.0  ;;  %v1277_v33 = vpack.c.bf16 %v1271_v20, %v1268_v26 }
 0x3e6   : > { %3435 = vmatpush3.bf16.msra.mxu1 %v1279_v18  ;;  %v1278_v29 = vpack.c.bf16 %v1272_v23, %v1269_v22  ;;  %v1276_v32 = vpack.c.bf16 %v1267_v19, %v1264_v25 }
 0x3e7   : > { %3436 = vmatprep.subr.bf16.mxu1 %v4008_v39 }
 0x3e8   : > { %1292 = vmatprep.subr.bf16.mxu0 %v1278_v29 }
 0x3e9   : > { %1293 = vmatpush1.bf16.msra.mxu0 %v1277_v33 }
 0x3ea   : > { %3437 = vmatpush3.bf16.msra.mxu1 %v1276_v32  ;;  %1294 = vmatprep.subr.bf16.mxu0 %v1275_v34 }
 0x3ed   : > { %3439 = vmatmul.mubr.msk.bf16.vlgmr.msra.gmra.mxu1 %vm735_vm11, %v4282_v28  ;;  %1295 = vmatpush1.bf16.msra.mxu0 %v1274_v36 }
 0x3ee   : > { %3452 = vmatprep.mubr.msk.bf16.mxu1 %vm593_vm0, %v4152_v5 }
 0x3f0   : > { %3120 = vmatmul.mubr.msk.bf16.vlgmr.msra.gmra.mxu0 %vm735_vm11, %v4282_v28 }
 0x3f1   : > { %1718 = vmatprep.mubr.bf16.mxu0 %v4006_v6 }
 0x4ad   : > { %v1355_v37 = vpop.f32.mrf.mxu1 }
 0x4ae   : > { %v1356_v40 = vadd.f32 %v1355_v37, %v4291_v30 }
 0x4af   : > { %v3440_v41 = vpop.f32.mrf.mxu1 }
 0x4b0   : > { %3819 = vtanh.f32 %v1356_v40  ;;  %v1314_v43 = vpop.f32.mrf.mxu0 }
 0x4b1   : > { %v1358_v45 = vpop.f32.mrf.mxu1  ;;  %v1315_v46 = vadd.f32 %v1314_v43, %v4291_v30 }
 0x4b2   : > { %v1316_v47 = vpop.f32.mrf.mxu0 }
 0x4b3   : > { %v3441_v48 = vpop.f32.mrf.mxu1  ;;  %3821 = vtanh.f32 %v1315_v46  ;;  %v1317_v5 = vadd.f32 %v1316_v47, %v4291_v30 }
 0x4b4   : > { %v1318_v51 = vpop.f32.mrf.mxu0 }
 0x4b5   : > { %3823 = vtanh.f32 %v1317_v5 }
 0x4b6   : > { %v1319_v52 = vpop.f32.mrf.mxu0 }
 0x4bd   : > { %v3820_v53 = vpop.eup %3819 }
 0x4be   : > { %v1366_v12 = vadd.f32 %v3820_v53, %v4304_v54 }
 0x4c0   : > { %v4442_v57 = vmul.f32 %v1366_v12, %v4300_v50  ;;  %v3822_v58 = vpop.eup %3821 }
 0x4c1   : > { %v1364_v3 = vadd.f32 %v3822_v58, %v4318_v61 }
 0x4c2   : > { %3124 = vst [vmem:[%s4106_s13 + $0x28] sm:$0xff] %v4442_v57  ;;  %1567 = vrot.lane.b32.xlu1 %v4442_v57, %s4000_s14  ;;  %v3303_v60 = vpack.c.bf16 %v4442_v57, %v4442_v57  ;;  %v3824_v62 = vpop.eup %3823 }
 0x4c3   : > { %v4452_v0 = vmul.f32 %v1364_v3, %v4306_v56  ;;  %v1365_v54 = vadd.f32 %v3824_v62, %v4324_v63 }
 0x4c4   : > { %1490 = vst [vmem:[#allocation3 + $0x38] sm:$0xf] %v3303_v60 }
 0x4c5   : > { %3122 = vst [vmem:[%s4106_s13 + $0x18] sm:$0xff] %v4452_v0  ;;  %v4458_v1 = vmul.f32 %v1365_v54, %v4311_v59 }
 0x4c6   : > { %1519 = vrot.lane.b32.xlu1 %v4442_v57, %s3999_s29 }
 0x4c7   : > { %3123 = vst [vmem:[%s4106_s13 + $0x20] sm:$0xff] %v4458_v1  ;;  %v3666_v61 = vpack.i.bf16 %v4458_v1, %v4452_v0 }
 0x4c9   : > { %3667 = vrot.lane.b32.xlu0 %v3666_v61, %s4000_s14 }
 0x4ca   : > { %1543 = vrot.lane.b32.xlu1 %v4442_v57, %s4001_s15 }
 0x4cd   : > { %3672 = vrot.lane.b32.xlu0 %v3666_v61, %s3999_s29 }
 0x4ce   : > { %1495 = vrot.lane.b32.xlu1 %v4442_v57, %s4002_s16 }
 0x4d1   : > { %3677 = vrot.lane.b32.xlu0 %v3666_v61, %s4001_s15 }
 0x4d2   : > { %1432 = vrot.lane.b32.xlu1 %v4442_v57, %s4939_s8 }
 0x4d5   : > { %3682 = vrot.lane.b32.xlu0 %v3666_v61, %s4002_s16 }
 0x4d6   : > { %1456 = vrot.lane.b32.xlu1 %v4442_v57, %s4940_s12 }
 0x4d9   : > { %3687 = vrot.lane.b32.xlu0 %v3666_v61, %s4939_s8 }
 0x4da   : > { %1384 = vrot.lane.b32.xlu1 %v4442_v57, %s4941_s20 }
 0x4dd   : > { %3692 = vrot.lane.b32.xlu0 %v3666_v61, %s4940_s12 }
 0x4de   : > { %1408 = vrot.lane.b32.xlu1 %v4442_v57, %s4942_s27 }
 0x4e1   : > { %3697 = vrot.lane.b32.xlu0 %v3666_v61, %s4941_s20 }
 0x4e5   : > { %3702 = vrot.lane.b32.xlu0 %v3666_v61, %s4942_s27 }
 0x534   : > { %v1568_v63 = vpop.permute.xlu1 %1567 }
 0x538   : > { %v1520_v2 = vpop.permute.xlu1 %1519 }
 0x53b   : > { %v3668_v7 = vpop.permute.xlu0 %3667 }
 0x53c   : > { %v1544_v4 = vpop.permute.xlu1 %1543  ;;  %v3670_v8 = vunpack.i.h.bf16 %v3668_v7  ;;  %v3669_v9 = vunpack.i.l.bf16 %v3668_v7 }
 0x53e   : > { %v1569_v10 = vsel %vm454_vm2, %v3670_v8, %v1568_v63  ;;  %v1570_v11 = vsel %vm454_vm2, %v3669_v9, %v3670_v8  ;;  %v1571_v14 = vsel %vm454_vm2, %v1568_v63, %v3669_v9 }
 0x53f   : > { %v3311_v15 = vpack.c.bf16 %v1571_v14, %v1571_v14  ;;  %v3673_v16 = vpop.permute.xlu0 %3672  ;;  %v3866_v20 = vpack.c.bf16 %v1569_v10, %v1569_v10  ;;  %v3867_v21 = vpack.c.bf16 %v1570_v11, %v1570_v11 }
 0x540   : > { %v3675_v17 = vunpack.i.h.bf16 %v3673_v16  ;;  %v3674_v18 = vunpack.i.l.bf16 %v3673_v16  ;;  %v1496_v19 = vpop.permute.xlu1 %1495 }
 0x541   : > { %1586 = vst [vmem:[#allocation3 + $0x68] sm:$0xf] %v3311_v15  ;;  %3158 = vmatprep.subr.msk.bf16.mxu0 %vm600_vm3, %v3866_v20  ;;  %v1678_v25 = vsel %vm600_vm3, %v3867_v21, 0 }
 0x542   : > { %v1523_v22 = vsel %vm404_vm1, %v1520_v2, %v3674_v18  ;;  %v1521_v26 = vsel %vm404_vm1, %v3675_v17, %v1520_v2  ;;  %v1522_v27 = vsel %vm404_vm1, %v3674_v18, %v3675_v17  ;;  %1693 = vmatpush1.bf16.msra.mxu0 %v1678_v25 }
 0x543   : > { %v3307_v23 = vpack.c.bf16 %v1523_v22, %v1523_v22  ;;  %v3678_v24 = vpop.permute.xlu0 %3677 }
 0x544   : > { %v3680_v29 = vunpack.i.h.bf16 %v3678_v24  ;;  %v3679_v31 = vunpack.i.l.bf16 %v3678_v24  ;;  %v1433_v35 = vpop.permute.xlu1 %1432 }
 0x545   : > { %1538 = vst [vmem:[#allocation3 + $0x50] sm:$0xf] %v3307_v23 }
 0x546   : > { %v1545_v32 = vsel %vm429_vm4, %v3680_v29, %v1544_v4  ;;  %v1546_v33 = vsel %vm429_vm4, %v3679_v31, %v3680_v29  ;;  %v1547_v34 = vsel %vm429_vm4, %v1544_v4, %v3679_v31 }
 0x547   : > { %v3309_v36 = vpack.c.bf16 %v1547_v34, %v1547_v34  ;;  %v3683_v37 = vpop.permute.xlu0 %3682  ;;  %v3868_v45 = vpack.c.bf16 %v1545_v32, %v1521_v26  ;;  %v3869_v46 = vpack.c.bf16 %v1546_v33, %v1522_v27 }
 0x548   : > { %v3685_v40 = vunpack.i.h.bf16 %v3683_v37  ;;  %v3684_v41 = vunpack.i.l.bf16 %v3683_v37  ;;  %v3798_v43 = vld [vmem:[#allocation3 + $0x68] ss:$0 sps:$4 sm:$0xff]   ;;  %v1457_v3 = vpop.permute.xlu1 %1456 }
 0x549   : > { %1562 = vst [vmem:[#allocation3 + $0x5c] sm:$0xf] %v3309_v36  ;;  %3510 = vmatprep.subr.msk.bf16.mxu1 %vm600_vm3, %v3798_v43  ;;  %v1684_v51 = vsel %vm600_vm3, %v3798_v43, 0  ;;  %1694 = vmatprep.subr.bf16.mxu0 %v3868_v45  ;;  %v4544_v43 = vld [vmem:[%s4921_s2] sm:$0xff]  }
 0x54a   : > { %v1497_v47 = vsel %vm379_vm5, %v3685_v40, %v1496_v19  ;;  %v1498_v48 = vsel %vm379_vm5, %v3684_v41, %v3685_v40  ;;  %v1499_v5 = vsel %vm379_vm5, %v1496_v19, %v3684_v41  ;;  %3443 = vmatpush3.bf16.msra.mxu1 %v1684_v51  ;;  %1695 = vmatpush1.bf16.msra.mxu0 %v3869_v46 }
 0x54b   : > { %v3305_v52 = vpack.c.bf16 %v1499_v5, %v1499_v5  ;;  %v3688_v53 = vpop.permute.xlu0 %3687  ;;  %v3870_v60 = vpack.c.bf16 %v1497_v47, %v4458_v1  ;;  %v3871_v62 = vpack.c.bf16 %v1498_v48, %v4452_v0 }
 0x54c   : > { %v3690_v12 = vunpack.i.h.bf16 %v3688_v53  ;;  %v3689_v58 = vunpack.i.l.bf16 %v3688_v53  ;;  %v1385_v15 = vpop.permute.xlu1 %1384 }
 0x54d   : > { %1514 = vst [vmem:[#allocation3 + $0x44] sm:$0xf] %v3305_v52  ;;  %1696 = vmatprep.subr.bf16.mxu0 %v3870_v60 }
 0x54e   : > { %v1434_v54 = vsel %vm314_vm6, %v3690_v12, %v1433_v35  ;;  %v1435_v2 = vsel %vm314_vm6, %v3689_v58, %v3690_v12  ;;  %v1436_v4 = vsel %vm314_vm6, %v1433_v35, %v3689_v58  ;;  %1697 = vmatpush1.bf16.msra.mxu0 %v3871_v62 }
 0x54f   : > { %v3299_v61 = vpack.c.bf16 %v1434_v54, %v1434_v54  ;;  %v3693_v63 = vpop.permute.xlu0 %3692 }
 0x550   : > { %v3695_v7 = vunpack.i.h.bf16 %v3693_v63  ;;  %v3694_v8 = vunpack.i.l.bf16 %v3693_v63  ;;  %v3799_v9 = vld [vmem:[#allocation3 + $0x50] ss:$12 sps:$4 sm:$0xff]   ;;  %v1409_v32 = vpop.permute.xlu1 %1408 }
 0x551   : > { %1451 = vst [vmem:[#allocation3 + $0x20] sm:$0xf] %v3299_v61  ;;  %3444 = vmatprep.subr.bf16.mxu1 %v3799_v9 }
 0x552   : > { %v1458_v10 = vsel %vm339_vm7, %v3695_v7, %v1457_v3  ;;  %v1459_v11 = vsel %vm339_vm7, %v3694_v8, %v3695_v7  ;;  %v1460_v14 = vsel %vm339_vm7, %v1457_v3, %v3694_v8  ;;  %3445 = vmatpush3.bf16.msra.mxu1 %v3799_v9 }
 0x553   : > { %v3301_v16 = vpack.c.bf16 %v1458_v10, %v1458_v10  ;;  %v3698_v17 = vpop.permute.xlu0 %3697  ;;  %v3872_v21 = vpack.c.bf16 %v1459_v11, %v1435_v2  ;;  %v3873_v22 = vpack.c.bf16 %v1460_v14, %v1436_v4 }
 0x554   : > { %v3700_v18 = vunpack.i.h.bf16 %v3698_v17  ;;  %v3699_v19 = vunpack.i.l.bf16 %v3698_v17  ;;  %v3800_v20 = vld [vmem:[#allocation3 + $0x38] ss:$12 sps:$4 sm:$0xff]  }
 0x555   : > { %1475 = vst [vmem:[#allocation3 + $0x2c] sm:$0xf] %v3301_v16  ;;  %3446 = vmatprep.subr.bf16.mxu1 %v3800_v20  ;;  %1698 = vmatprep.subr.bf16.mxu0 %v3872_v21 }
 0x556   : > { %v1386_v23 = vsel %vm264_vm8, %v3700_v18, %v1385_v15  ;;  %3447 = vmatpush3.bf16.msra.mxu1 %v3800_v20  ;;  %v1387_v26 = vsel %vm264_vm8, %v3699_v19, %v3700_v18  ;;  %v1388_v27 = vsel %vm264_vm8, %v1385_v15, %v3699_v19  ;;  %1699 = vmatpush1.bf16.msra.mxu0 %v3873_v22 }
 0x557   : > { %v3295_v24 = vpack.c.bf16 %v1386_v23, %v1386_v23  ;;  %v3703_v25 = vpop.permute.xlu0 %3702 }
 0x558   : > { %v3705_v29 = vunpack.i.h.bf16 %v3703_v25  ;;  %v3704_v31 = vunpack.i.l.bf16 %v3703_v25 }
 0x559   : > { %1403 = vst [vmem:[#allocation3 + $0x8] sm:$0xf] %v3295_v24 }
 0x55a   : > { %v1410_v33 = vsel %vm289_vm9, %v3705_v29, %v1409_v32  ;;  %v1411_v34 = vsel %vm289_vm9, %v3704_v31, %v3705_v29  ;;  %v1412_v35 = vsel %vm289_vm9, %v1409_v32, %v3704_v31 }
 0x55b   : > { %v3297_v36 = vpack.c.bf16 %v1410_v33, %v1410_v33  ;;  %v3874_v40 = vpack.c.bf16 %v1411_v34, %v1387_v26  ;;  %v3875_v41 = vpack.c.bf16 %v1412_v35, %v1388_v27 }
 0x55c   : > { %v3801_v37 = vld [vmem:[#allocation3 + $0x20] ss:$12 sps:$4 sm:$0xff]  }
 0x55d   : > { %1427 = vst [vmem:[#allocation3 + $0x14] sm:$0xf] %v3297_v36  ;;  %3448 = vmatprep.subr.bf16.mxu1 %v3801_v37  ;;  %1700 = vmatprep.subr.bf16.mxu0 %v3874_v40 }
 0x55e   : > { %3449 = vmatpush3.bf16.msra.mxu1 %v3801_v37  ;;  %1701 = vmatpush1.bf16.msra.mxu0 %v3875_v41 }
 0x55f   : > { %3456 = vmatprep.subr.bf16.mxu0 %v4008_v39 }
 0x561   : > { %3159 = vmatmul.mubr.msk.bf16.vlgmr.msra.gmra.mxu0 %vm593_vm0, %v4544_v43 }
 0x562   : > { %1728 = vmatprep.mubr.bf16.mxu0 %v4006_v6 }
 0x564   : > { %v3802_v45 = vld [vmem:[#allocation3 + $0x8] ss:$12 sps:$4 sm:$0xff]  }
 0x565   : > { %3450 = vmatprep.subr.bf16.mxu1 %v3802_v45 }
 0x566   : > { %3451 = vmatpush3.bf16.msra.mxu1 %v3802_v45 }
 0x569   : > { %3453 = vmatmul.mubr.msk.bf16.vlgmr.msra.gmra.mxu1 %vm593_vm0, %v4248_v38  ;;  %3160 = vmatmul.mubr.msk.bf16.gmra.mxu0 %vm593_vm0, %v4248_v38 }
 0x56a   : > { %1838 = vmatprep.mubr.bf16.mxu1 %v4006_v6  ;;  %3460 = vmatprep.mubr.msk.bf16.mxu0 %vm4009_vm10, %v4008_v39 }
 0x621   : > { %v1720_v46 = vpop.f32.mrf.mxu0 }
 0x622   : > { %v1721_v22 = vadd.f32 %v1720_v46, %v4263_v49 }
 0x623   : > { %v1722_v47 = vpop.f32.mrf.mxu0 }
 0x624   : > { %v1723_v11 = vadd.f32 %v1722_v47, %v4263_v49  ;;  %v1788_v33 = vmax.f32 %v1721_v22, 0.0 }
 0x625   : > { %v1724_v48 = vpop.f32.mrf.mxu0 }
 0x626   : > { %v1725_v15 = vadd.f32 %v1724_v48, %v4266_v55  ;;  %v1789_v25 = vmax.f32 %v1723_v11, 0.0 }
 0x627   : > { %v1726_v5 = vpop.f32.mrf.mxu0 }
 0x628   : > { %v1727_v38 = vadd.f32 %v1726_v5, %v4266_v55  ;;  %v1791_v27 = vmax.f32 %v1725_v15, 0.0 }
 0x629   : > { %v3454_v51 = vpop.f32.mrf.mxu1  ;;  %v1730_v52 = vpop.f32.mrf.mxu0 }
 0x62a   : > { %v1782_v12 = vadd.f32 %v3454_v51, %v4260_v44  ;;  %v1731_v61 = vadd.f32 %v1730_v52, %v4260_v44  ;;  %v1792_v19 = vmax.f32 %v1727_v38, 0.0  ;;  %v1800_v34 = vpack.c.bf16 %v1791_v27, %v1788_v33 }
 0x62b   : > { %v1773_v53 = vpop.f32.mrf.mxu1  ;;  %v1732_v58 = vpop.f32.mrf.mxu0 }
 0x62c   : > { %v1733_v63 = vadd.f32 %v1732_v58, %v4260_v44  ;;  %v1796_v4 = vmax.f32 %v1782_v12, 0.0  ;;  %v1774_v7 = vadd.f32 %v1773_v53, %v4263_v49  ;;  %v1794_v24 = vmax.f32 %v1731_v61, 0.0 }
 0x62d   : > { %v3455_v3 = vpop.f32.mrf.mxu1  ;;  %v1734_v62 = vpop.f32.mrf.mxu0  ;;  %v1801_v32 = vpack.c.bf16 %v1792_v19, %v1789_v25 }
 0x62e   : > { %v1785_v60 = vadd.f32 %v3455_v3, %v4258_v42  ;;  %v1735_v2 = vadd.f32 %v1734_v62, %v4258_v42  ;;  %v1795_v20 = vmax.f32 %v1733_v63, 0.0  ;;  %v1790_v23 = vmax.f32 %v1774_v7, 0.0 }
 0x62f   : > { %v1776_v54 = vpop.f32.mrf.mxu1  ;;  %v1736_v10 = vpop.f32.mrf.mxu0 }
 0x630   : > { %v1799_v8 = vmax.f32 %v1785_v60, 0.0  ;;  %v1777_v9 = vadd.f32 %v1776_v54, %v4266_v55  ;;  %v1737_v14 = vadd.f32 %v1736_v10, %v4258_v42  ;;  %v1797_v18 = vmax.f32 %v1735_v2, 0.0 }
 0x632   : > { %v1805_v16 = vpack.c.bf16 %v1799_v8, %v1796_v4  ;;  %v1793_v17 = vmax.f32 %v1777_v9, 0.0  ;;  %v1798_v21 = vmax.f32 %v1737_v14, 0.0  ;;  %v1803_v31 = vpack.c.bf16 %v1797_v18, %v1794_v24 }
 0x634   : > { %3457 = vmatpush3.bf16.msra.mxu0 %v1805_v16  ;;  %v1804_v26 = vpack.c.bf16 %v1798_v21, %v1795_v20  ;;  %v1802_v29 = vpack.c.bf16 %v1793_v17, %v1790_v23 }
 0x635   : > { %3458 = vmatprep.subr.bf16.mxu0 %v4008_v39 }
 0x636   : > { %1818 = vmatprep.subr.bf16.mxu1 %v1804_v26 }
 0x637   : > { %1819 = vmatpush1.bf16.msra.mxu1 %v1803_v31 }
 0x638   : > { %3459 = vmatpush3.bf16.msra.mxu0 %v1802_v29  ;;  %1820 = vmatprep.subr.bf16.mxu1 %v1801_v32 }
 0x63b   : > { %3461 = vmatmul.mubr.msk.bf16.vlgmr.msra.gmra.mxu0 %vm735_vm11, %v4282_v28  ;;  %1821 = vmatpush1.bf16.msra.mxu1 %v1800_v34 }
 0x63c   : > { %3474 = vmatprep.mubr.msk.bf16.mxu0 %vm593_vm0, %v4544_v43 }
 0x63e   : > { %3163 = vmatmul.mubr.msk.bf16.vlgmr.msra.gmra.mxu1 %vm735_vm11, %v4282_v28 }
 0x63f   : > { %2244 = vmatprep.mubr.bf16.mxu1 %v4006_v6 }
 0x6fb   : > { %v1881_v35 = vpop.f32.mrf.mxu0 }
 0x6fc   : > { %v1882_v36 = vadd.f32 %v1881_v35, %v4291_v30 }
 0x6fd   : > { %v3462_v37 = vpop.f32.mrf.mxu0 }
 0x6fe   : > { %3825 = vtanh.f32 %v1882_v36  ;;  %v1840_v40 = vpop.f32.mrf.mxu1 }
 0x6ff   : > { %v1884_v41 = vpop.f32.mrf.mxu0  ;;  %v1841_v45 = vadd.f32 %v1840_v40, %v4291_v30 }
 0x700   : > { %v1842_v46 = vpop.f32.mrf.mxu1 }
 0x701   : > { %v3463_v47 = vpop.f32.mrf.mxu0  ;;  %3827 = vtanh.f32 %v1841_v45  ;;  %v1843_v48 = vadd.f32 %v1842_v46, %v4291_v30 }
 0x702   : > { %v1844_v5 = vpop.f32.mrf.mxu1 }
 0x703   : > { %3829 = vtanh.f32 %v1843_v48 }
 0x704   : > { %v1845_v28 = vpop.f32.mrf.mxu1 }
 0x70b   : > { %v3826_v51 = vpop.eup %3825 }
 0x70c   : > { %v1892_v52 = vadd.f32 %v3826_v51, %v4442_v57 }
 0x70e   : > { %v4581_v53 = vmul.f32 %v1892_v52, %v4300_v50  ;;  %v3828_v12 = vpop.eup %3827 }
 0x70f   : > { %v1890_v58 = vadd.f32 %v3828_v12, %v4452_v0 }
 0x710   : > { %3167 = vst [vmem:[%s4106_s13 + $0x40] sm:$0xff] %v4581_v53  ;;  %2093 = vrot.lane.b32.xlu1 %v4581_v53, %s4000_s14  ;;  %v3321_v3 = vpack.c.bf16 %v4581_v53, %v4581_v53  ;;  %v3830_v60 = vpop.eup %3829 }
 0x711   : > { %v4591_v62 = vmul.f32 %v1890_v58, %v4306_v56  ;;  %v1891_v57 = vadd.f32 %v3830_v60, %v4458_v1 }
 0x712   : > { %2016 = vst [vmem:[#allocation3 + $0x38] sm:$0xf] %v3321_v3 }
 0x713   : > { %3165 = vst [vmem:[%s4106_s13 + $0x30] sm:$0xff] %v4591_v62  ;;  %v4597_v38 = vmul.f32 %v1891_v57, %v4311_v59 }
 0x714   : > { %2045 = vrot.lane.b32.xlu1 %v4581_v53, %s3999_s29 }
 0x715   : > { %3166 = vst [vmem:[%s4106_s13 + $0x38] sm:$0xff] %v4597_v38  ;;  %v3706_v0 = vpack.i.bf16 %v4597_v38, %v4591_v62 }
 0x717   : > { %3707 = vrot.lane.b32.xlu0 %v3706_v0, %s4000_s14 }
 0x718   : > { %2069 = vrot.lane.b32.xlu1 %v4581_v53, %s4001_s15 }
 0x71b   : > { %3712 = vrot.lane.b32.xlu0 %v3706_v0, %s3999_s29 }
 0x71c   : > { %2021 = vrot.lane.b32.xlu1 %v4581_v53, %s4002_s16 }
 0x71f   : > { %3717 = vrot.lane.b32.xlu0 %v3706_v0, %s4001_s15 }
 0x720   : > { %1958 = vrot.lane.b32.xlu1 %v4581_v53, %s4939_s8 }
 0x723   : > { %3722 = vrot.lane.b32.xlu0 %v3706_v0, %s4002_s16 }
 0x724   : > { %1982 = vrot.lane.b32.xlu1 %v4581_v53, %s4940_s12 }
 0x727   : > { %3727 = vrot.lane.b32.xlu0 %v3706_v0, %s4939_s8 }
 0x728   : > { %1910 = vrot.lane.b32.xlu1 %v4581_v53, %s4941_s20 }
 0x72b   : > { %3732 = vrot.lane.b32.xlu0 %v3706_v0, %s4940_s12 }
 0x72c   : > { %1934 = vrot.lane.b32.xlu1 %v4581_v53, %s4942_s27 }
 0x72f   : > { %3737 = vrot.lane.b32.xlu0 %v3706_v0, %s4941_s20 }
 0x733   : > { %3742 = vrot.lane.b32.xlu0 %v3706_v0, %s4942_s27 }
 0x782   : > { %v2094_v1 = vpop.permute.xlu1 %2093 }
 0x786   : > { %v2046_v54 = vpop.permute.xlu1 %2045 }
 0x789   : > { %v3708_v63 = vpop.permute.xlu0 %3707 }
 0x78a   : > { %v2070_v61 = vpop.permute.xlu1 %2069  ;;  %v3710_v2 = vunpack.i.h.bf16 %v3708_v63  ;;  %v3709_v4 = vunpack.i.l.bf16 %v3708_v63 }
 0x78c   : > { %v2095_v7 = vsel %vm454_vm2, %v3710_v2, %v2094_v1  ;;  %v2096_v8 = vsel %vm454_vm2, %v3709_v4, %v3710_v2  ;;  %v2097_v9 = vsel %vm454_vm2, %v2094_v1, %v3709_v4 }
 0x78d   : > { %v3329_v10 = vpack.c.bf16 %v2097_v9, %v2097_v9  ;;  %v3713_v11 = vpop.permute.xlu0 %3712  ;;  %v3876_v17 = vpack.c.bf16 %v2095_v7, %v2095_v7  ;;  %v3877_v18 = vpack.c.bf16 %v2096_v8, %v2096_v8 }
 0x78e   : > { %v3715_v14 = vunpack.i.h.bf16 %v3713_v11  ;;  %v3714_v15 = vunpack.i.l.bf16 %v3713_v11  ;;  %v2022_v16 = vpop.permute.xlu1 %2021 }
 0x78f   : > { %2112 = vst [vmem:[#allocation3 + $0x68] sm:$0xf] %v3329_v10  ;;  %3201 = vmatprep.subr.msk.bf16.mxu1 %vm600_vm3, %v3876_v17  ;;  %v2204_v22 = vsel %vm600_vm3, %v3877_v18, 0 }
 0x790   : > { %v2049_v19 = vsel %vm404_vm1, %v2046_v54, %v3714_v15  ;;  %v2047_v23 = vsel %vm404_vm1, %v3715_v14, %v2046_v54  ;;  %v2048_v24 = vsel %vm404_vm1, %v3714_v15, %v3715_v14  ;;  %2219 = vmatpush1.bf16.msra.mxu1 %v2204_v22 }
 0x791   : > { %v3325_v20 = vpack.c.bf16 %v2049_v19, %v2049_v19  ;;  %v3718_v21 = vpop.permute.xlu0 %3717 }
 0x792   : > { %v3720_v25 = vunpack.i.h.bf16 %v3718_v21  ;;  %v3719_v26 = vunpack.i.l.bf16 %v3718_v21  ;;  %v1959_v32 = vpop.permute.xlu1 %1958 }
 0x793   : > { %2064 = vst [vmem:[#allocation3 + $0x50] sm:$0xf] %v3325_v20 }
 0x794   : > { %v2071_v27 = vsel %vm429_vm4, %v3720_v25, %v2070_v61  ;;  %v2072_v29 = vsel %vm429_vm4, %v3719_v26, %v3720_v25  ;;  %v2073_v31 = vsel %vm429_vm4, %v2070_v61, %v3719_v26 }
 0x795   : > { %v3327_v33 = vpack.c.bf16 %v2073_v31, %v2073_v31  ;;  %v3723_v34 = vpop.permute.xlu0 %3722  ;;  %v3878_v40 = vpack.c.bf16 %v2071_v27, %v2047_v23  ;;  %v3879_v41 = vpack.c.bf16 %v2072_v29, %v2048_v24 }
 0x796   : > { %v3725_v35 = vunpack.i.h.bf16 %v3723_v34  ;;  %v3724_v36 = vunpack.i.l.bf16 %v3723_v34  ;;  %v3803_v37 = vld [vmem:[#allocation3 + $0x68] ss:$0 sps:$4 sm:$0xff]   ;;  %v1983_v12 = vpop.permute.xlu1 %1982 }
 0x797   : > { %2088 = vst [vmem:[#allocation3 + $0x5c] sm:$0xf] %v3327_v33  ;;  %3511 = vmatprep.subr.msk.bf16.mxu0 %vm600_vm3, %v3803_v37  ;;  %v2210_v48 = vsel %vm600_vm3, %v3803_v37, 0  ;;  %2220 = vmatprep.subr.bf16.mxu1 %v3878_v40  ;;  %v4686_v37 = vld [vmem:[%s4921_s2 + $0x8] sm:$0xff]  }
 0x798   : > { %v2023_v45 = vsel %vm379_vm5, %v3725_v35, %v2022_v16  ;;  %v2024_v46 = vsel %vm379_vm5, %v3724_v36, %v3725_v35  ;;  %v2025_v47 = vsel %vm379_vm5, %v2022_v16, %v3724_v36  ;;  %3465 = vmatpush3.bf16.msra.mxu0 %v2210_v48  ;;  %2221 = vmatpush1.bf16.msra.mxu1 %v3879_v41 }
 0x799   : > { %v3323_v5 = vpack.c.bf16 %v2025_v47, %v2025_v47  ;;  %v3728_v28 = vpop.permute.xlu0 %3727  ;;  %v3880_v58 = vpack.c.bf16 %v2023_v45, %v4597_v38  ;;  %v3881_v3 = vpack.c.bf16 %v2024_v46, %v4591_v62 }
 0x79a   : > { %v3730_v51 = vunpack.i.h.bf16 %v3728_v28  ;;  %v3729_v52 = vunpack.i.l.bf16 %v3728_v28  ;;  %v1911_v9 = vpop.permute.xlu1 %1910 }
 0x79b   : > { %2040 = vst [vmem:[#allocation3 + $0x44] sm:$0xf] %v3323_v5  ;;  %2222 = vmatprep.subr.bf16.mxu1 %v3880_v58 }
 0x79c   : > { %v1960_v60 = vsel %vm314_vm6, %v3730_v51, %v1959_v32  ;;  %v1961_v1 = vsel %vm314_vm6, %v3729_v52, %v3730_v51  ;;  %v1962_v54 = vsel %vm314_vm6, %v1959_v32, %v3729_v52  ;;  %2223 = vmatpush1.bf16.msra.mxu1 %v3881_v3 }
 0x79d   : > { %v3317_v57 = vpack.c.bf16 %v1960_v60, %v1960_v60  ;;  %v3733_v0 = vpop.permute.xlu0 %3732 }
 0x79e   : > { %v3735_v61 = vunpack.i.h.bf16 %v3733_v0  ;;  %v3734_v63 = vunpack.i.l.bf16 %v3733_v0  ;;  %v3804_v2 = vld [vmem:[#allocation3 + $0x50] ss:$12 sps:$4 sm:$0xff]   ;;  %v1935_v26 = vpop.permute.xlu1 %1934 }
 0x79f   : > { %1977 = vst [vmem:[#allocation3 + $0x20] sm:$0xf] %v3317_v57  ;;  %3466 = vmatprep.subr.bf16.mxu0 %v3804_v2 }
 0x7a0   : > { %v1984_v4 = vsel %vm339_vm7, %v3735_v61, %v1983_v12  ;;  %v1985_v7 = vsel %vm339_vm7, %v3734_v63, %v3735_v61  ;;  %v1986_v8 = vsel %vm339_vm7, %v1983_v12, %v3734_v63  ;;  %3467 = vmatpush3.bf16.msra.mxu0 %v3804_v2 }
 0x7a1   : > { %v3319_v10 = vpack.c.bf16 %v1984_v4, %v1984_v4  ;;  %v3738_v11 = vpop.permute.xlu0 %3737  ;;  %v3882_v17 = vpack.c.bf16 %v1985_v7, %v1961_v1  ;;  %v3883_v18 = vpack.c.bf16 %v1986_v8, %v1962_v54 }
 0x7a2   : > { %v3740_v14 = vunpack.i.h.bf16 %v3738_v11  ;;  %v3739_v15 = vunpack.i.l.bf16 %v3738_v11  ;;  %v3805_v16 = vld [vmem:[#allocation3 + $0x38] ss:$12 sps:$4 sm:$0xff]  }
 0x7a3   : > { %2001 = vst [vmem:[#allocation3 + $0x2c] sm:$0xf] %v3319_v10  ;;  %3468 = vmatprep.subr.bf16.mxu0 %v3805_v16  ;;  %2224 = vmatprep.subr.bf16.mxu1 %v3882_v17 }
 0x7a4   : > { %v1912_v19 = vsel %vm264_vm8, %v3740_v14, %v1911_v9  ;;  %3469 = vmatpush3.bf16.msra.mxu0 %v3805_v16  ;;  %v1913_v22 = vsel %vm264_vm8, %v3739_v15, %v3740_v14  ;;  %v1914_v23 = vsel %vm264_vm8, %v1911_v9, %v3739_v15  ;;  %2225 = vmatpush1.bf16.msra.mxu1 %v3883_v18 }
 0x7a5   : > { %v3313_v20 = vpack.c.bf16 %v1912_v19, %v1912_v19  ;;  %v3743_v21 = vpop.permute.xlu0 %3742 }
 0x7a6   : > { %v3745_v24 = vunpack.i.h.bf16 %v3743_v21  ;;  %v3744_v25 = vunpack.i.l.bf16 %v3743_v21 }
 0x7a7   : > { %1929 = vst [vmem:[#allocation3 + $0x8] sm:$0xf] %v3313_v20 }
 0x7a8   : > { %v1936_v27 = vsel %vm289_vm9, %v3745_v24, %v1935_v26  ;;  %v1937_v29 = vsel %vm289_vm9, %v3744_v25, %v3745_v24  ;;  %v1938_v31 = vsel %vm289_vm9, %v1935_v26, %v3744_v25 }
 0x7a9   : > { %v3315_v32 = vpack.c.bf16 %v1936_v27, %v1936_v27  ;;  %v3884_v34 = vpack.c.bf16 %v1937_v29, %v1913_v22  ;;  %v3885_v35 = vpack.c.bf16 %v1938_v31, %v1914_v23  ;;  %v4711_v31 = vld [vmem:[%s4923_s4] sm:$0xf] }
 0x7aa   : > { %v3806_v33 = vld [vmem:[#allocation3 + $0x20] ss:$12 sps:$4 sm:$0xff]  }
 0x7ab   : > { %1953 = vst [vmem:[#allocation3 + $0x14] sm:$0xf] %v3315_v32  ;;  %3470 = vmatprep.subr.bf16.mxu0 %v3806_v33  ;;  %2226 = vmatprep.subr.bf16.mxu1 %v3884_v34 }
 0x7ac   : > { %3471 = vmatpush3.bf16.msra.mxu0 %v3806_v33  ;;  %2227 = vmatpush1.bf16.msra.mxu1 %v3885_v35 }
 0x7ad   : > { %3478 = vmatprep.subr.bf16.mxu1 %v4008_v39 }
 0x7af   : > { %3202 = vmatmul.mubr.msk.bf16.vlgmr.msra.gmra.mxu1 %vm593_vm0, %v4544_v43 }
 0x7b0   : > { %2254 = vmatprep.mubr.bf16.mxu1 %v4006_v6 }
 0x7b2   : > { %v3807_v36 = vld [vmem:[#allocation3 + $0x8] ss:$12 sps:$4 sm:$0xff]  }
 0x7b3   : > { %3472 = vmatprep.subr.bf16.mxu0 %v3807_v36 }
 0x7b4   : > { %3473 = vmatpush3.bf16.msra.mxu0 %v3807_v36 }
 0x7b7   : > { %3475 = vmatmul.mubr.msk.bf16.vlgmr.msra.gmra.mxu0 %vm593_vm0, %v4686_v37  ;;  %3203 = vmatmul.mubr.msk.bf16.gmra.mxu1 %vm593_vm0, %v4686_v37 }
 0x7b8   : > { %2364 = vmatprep.mubr.bf16.mxu0 %v4006_v6  ;;  %3482 = vmatprep.mubr.msk.bf16.mxu1 %vm4009_vm10, %v4008_v39 }
 0x86f   : > { %v2246_v40 = vpop.f32.mrf.mxu1 }
 0x870   : > { %v2247_v18 = vadd.f32 %v2246_v40, %v4263_v49 }
 0x871   : > { %v2248_v41 = vpop.f32.mrf.mxu1 }
 0x872   : > { %v2249_v7 = vadd.f32 %v2248_v41, %v4263_v49  ;;  %v2314_v27 = vmax.f32 %v2247_v18, 0.0 }
 0x873   : > { %v2250_v45 = vpop.f32.mrf.mxu1 }
 0x874   : > { %v2251_v9 = vadd.f32 %v2250_v45, %v4266_v55  ;;  %v2315_v21 = vmax.f32 %v2249_v7, 0.0 }
 0x875   : > { %v2252_v46 = vpop.f32.mrf.mxu1 }
 0x876   : > { %v2253_v3 = vadd.f32 %v2252_v46, %v4266_v55  ;;  %v2317_v23 = vmax.f32 %v2251_v9, 0.0 }
 0x877   : > { %v3476_v47 = vpop.f32.mrf.mxu0  ;;  %v2256_v48 = vpop.f32.mrf.mxu1 }
 0x878   : > { %v2308_v28 = vadd.f32 %v3476_v47, %v4260_v44  ;;  %v2257_v57 = vadd.f32 %v2256_v48, %v4260_v44  ;;  %v2318_v15 = vmax.f32 %v2253_v3, 0.0  ;;  %v2326_v29 = vpack.c.bf16 %v2317_v23, %v2314_v27 }
 0x879   : > { %v2299_v5 = vpop.f32.mrf.mxu0  ;;  %v2258_v51 = vpop.f32.mrf.mxu1 }
 0x87a   : > { %v2259_v0 = vadd.f32 %v2258_v51, %v4260_v44  ;;  %v2322_v54 = vmax.f32 %v2308_v28, 0.0  ;;  %v2300_v61 = vadd.f32 %v2299_v5, %v4263_v49  ;;  %v2320_v20 = vmax.f32 %v2257_v57, 0.0 }
 0x87b   : > { %v3477_v52 = vpop.f32.mrf.mxu0  ;;  %v2260_v58 = vpop.f32.mrf.mxu1  ;;  %v2327_v26 = vpack.c.bf16 %v2318_v15, %v2315_v21 }
 0x87c   : > { %v2311_v12 = vadd.f32 %v3477_v52, %v4258_v42  ;;  %v2261_v1 = vadd.f32 %v2260_v58, %v4258_v42  ;;  %v2321_v16 = vmax.f32 %v2259_v0, 0.0  ;;  %v2316_v19 = vmax.f32 %v2300_v61, 0.0 }
 0x87d   : > { %v2302_v60 = vpop.f32.mrf.mxu0  ;;  %v2262_v4 = vpop.f32.mrf.mxu1 }
 0x87e   : > { %v2325_v63 = vmax.f32 %v2311_v12, 0.0  ;;  %v2303_v2 = vadd.f32 %v2302_v60, %v4266_v55  ;;  %v2263_v8 = vadd.f32 %v2262_v4, %v4258_v42  ;;  %v2323_v14 = vmax.f32 %v2261_v1, 0.0 }
 0x880   : > { %v2331_v10 = vpack.c.bf16 %v2325_v63, %v2322_v54  ;;  %v2319_v11 = vmax.f32 %v2303_v2, 0.0  ;;  %v2324_v17 = vmax.f32 %v2263_v8, 0.0  ;;  %v2329_v25 = vpack.c.bf16 %v2323_v14, %v2320_v20 }
 0x882   : > { %3479 = vmatpush3.bf16.msra.mxu1 %v2331_v10  ;;  %v2330_v22 = vpack.c.bf16 %v2324_v17, %v2321_v16  ;;  %v2328_v24 = vpack.c.bf16 %v2319_v11, %v2316_v19 }
 0x883   : > { %3480 = vmatprep.subr.bf16.mxu1 %v4008_v39 }
 0x884   : > { %2344 = vmatprep.subr.bf16.mxu0 %v2330_v22 }
 0x885   : > { %2345 = vmatpush1.bf16.msra.mxu0 %v2329_v25 }
 0x886   : > { %3481 = vmatpush3.bf16.msra.mxu1 %v2328_v24  ;;  %2346 = vmatprep.subr.bf16.mxu0 %v2327_v26 }
 0x889   : > { %3483 = vmatmul.mubr.msk.bf16.vlgmr.msra.gmra.mxu1 %vm735_vm11, %v4711_v31  ;;  %2347 = vmatpush1.bf16.msra.mxu0 %v2326_v29 }
 0x88a   : > { %3496 = vmatprep.mubr.msk.bf16.mxu1 %vm593_vm0, %v4544_v43 }
 0x88c   : > { %3206 = vmatmul.mubr.msk.bf16.vlgmr.msra.gmra.mxu0 %vm735_vm11, %v4711_v31 }
 0x88d   : > { %2770 = vmatprep.mubr.bf16.mxu0 %v4006_v6 }
 0x949   : > { %v2407_v32 = vpop.f32.mrf.mxu1 }
 0x94a   : > { %v2408_v33 = vadd.f32 %v2407_v32, %v4291_v30 }
 0x94b   : > { %v3484_v34 = vpop.f32.mrf.mxu1 }
 0x94c   : > { %3831 = vtanh.f32 %v2408_v33  ;;  %v2366_v35 = vpop.f32.mrf.mxu0 }
 0x94d   : > { %v2410_v36 = vpop.f32.mrf.mxu1  ;;  %v2367_v40 = vadd.f32 %v2366_v35, %v4291_v30 }
 0x94e   : > { %v2368_v41 = vpop.f32.mrf.mxu0 }
 0x94f   : > { %v3485_v45 = vpop.f32.mrf.mxu1  ;;  %3833 = vtanh.f32 %v2367_v40  ;;  %v2369_v46 = vadd.f32 %v2368_v41, %v4291_v30 }
 0x950   : > { %v2370_v47 = vpop.f32.mrf.mxu0 }
 0x951   : > { %3835 = vtanh.f32 %v2369_v46 }
 0x952   : > { %v2371_v48 = vpop.f32.mrf.mxu0 }
 0x959   : > { %v3832_v5 = vpop.eup %3831 }
 0x95a   : > { %v2418_v28 = vadd.f32 %v3832_v5, %v4581_v53 }
 0x95c   : > { %v4725_v51 = vmul.f32 %v2418_v28, %v4300_v50  ;;  %v3834_v52 = vpop.eup %3833 }
 0x95d   : > { %v2416_v12 = vadd.f32 %v3834_v52, %v4591_v62 }
 0x95e   : > { %3210 = vst [vmem:[%s4106_s13 + $0x58] sm:$0xff] %v4725_v51  ;;  %2619 = vrot.lane.b32.xlu1 %v4725_v51, %s4000_s14  ;;  %v3339_v58 = vpack.c.bf16 %v4725_v51, %v4725_v51  ;;  %v3836_v3 = vpop.eup %3835 }
 0x95f   : > { %v4735_v60 = vmul.f32 %v2416_v12, %v4306_v56  ;;  %v2417_v53 = vadd.f32 %v3836_v3, %v4597_v38 }
 0x960   : > { %2542 = vst [vmem:[#allocation3 + $0x38] sm:$0xf] %v3339_v58 }
 0x961   : > { %3208 = vst [vmem:[%s4106_s13 + $0x48] sm:$0xff] %v4735_v60  ;;  %v4741_v57 = vmul.f32 %v2417_v53, %v4311_v59 }
 0x962   : > { %2571 = vrot.lane.b32.xlu1 %v4725_v51, %s3999_s29 }
 0x963   : > { %3209 = vst [vmem:[%s4106_s13 + $0x50] sm:$0xff] %v4741_v57  ;;  %v3746_v62 = vpack.i.bf16 %v4741_v57, %v4735_v60 }
 0x965   : > { %3747 = vrot.lane.b32.xlu0 %v3746_v62, %s4000_s14  ;;  %s2972_s14 = sshll.u32 %s4106_s13, 4  ;;  %s4867_s14 = int_to_ptr.vmem [resolvable:$true] %s2972_s14 }
 0x966   : > { %2595 = vrot.lane.b32.xlu1 %v4725_v51, %s4001_s15 }
 0x969   : > { %3752 = vrot.lane.b32.xlu0 %v3746_v62, %s3999_s29  ;;  %s3514_s29 = smul.u32 1920, %s3988_s24  ;;  %s4943_s24 = sand.u32 1, %s3980_s22  }
 0x96a   : > { %2547 = vrot.lane.b32.xlu1 %v4725_v51, %s4002_s16 }
 0x96d   : > { %3757 = vrot.lane.b32.xlu0 %v3746_v62, %s4001_s15 }
 0x96e   : > { %2484 = vrot.lane.b32.xlu1 %v4725_v51, %s4939_s8 }
 0x971   : > { %3762 = vrot.lane.b32.xlu0 %v3746_v62, %s4002_s16 }
 0x972   : > { %2508 = vrot.lane.b32.xlu1 %v4725_v51, %s4940_s12 }
 0x975   : > { %3767 = vrot.lane.b32.xlu0 %v3746_v62, %s4939_s8  ;;  %s4865_s8 = scalar_lea.hbm %s4925_s6, %s3514_s29 }
 0x976   : > { %2436 = vrot.lane.b32.xlu1 %v4725_v51, %s4941_s20 }
 0x979   : > { %3772 = vrot.lane.b32.xlu0 %v3746_v62, %s4940_s12  ;;  %s4874_s12 = scalar_lea.sflag [#allocation5], %s4943_s24 }
 0x97a   : > { %2460 = vrot.lane.b32.xlu1 %v4725_v51, %s4942_s27 }
 0x97d   : > { %3777 = vrot.lane.b32.xlu0 %v3746_v62, %s4941_s20  ;;  %s3918_s20 = scalar_lea.vmem %s4867_s14, 1920 }
 0x97e   : > { %p3919_p9 = scmp.ne.s32.totalorder %s4867_s14, %s3918_s20 }
 0x980   : > { %p3920_p10 = pnand %p3919_p9, %p4088_p4 }
 0x981   : > { %3782 = vrot.lane.b32.xlu0 %v3746_v62, %s4942_s27  ;;  %s4010_s27 = smov [#allocation4]  }
 0x982   : > { %p3921_p11 = pneg %p3920_p10  ;;  %s3922_s11 = sshll.u32 %s4010_s27, 4  ;;  %s3923_s11 = int_to_ptr.vmem [resolvable:$false] %s3922_s11 }
 0x983   : > { %s3924_s17 = scalar_lea.vmem %s3923_s11, 3840  ;;  %p3925_p12 = scmp.lt.s32.totalorder %s4867_s14, %s3923_s11 }
 0x984   : > { %p3926_p13 = scmp.lt.s32.totalorder %s3924_s17, %s3918_s20 }
 0x986   : > { %p3927_p0 = por %p3926_p13, %p3925_p12 }
 0x988   : > { %p3928_p1 = pnand %p3927_p0, %p3921_p11 }
 0x9d0   : > { %v2620_v38 = vpop.permute.xlu1 %2619 }
 0x9d4   : > { %v2572_v0 = vpop.permute.xlu1 %2571 }
 0x9d7   : > { %v3748_v54 = vpop.permute.xlu0 %3747 }
 0x9d8   : > { %v2596_v1 = vpop.permute.xlu1 %2595  ;;  %v3750_v61 = vunpack.i.h.bf16 %v3748_v54  ;;  %v3749_v63 = vunpack.i.l.bf16 %v3748_v54 }
 0x9da   : > { %v2621_v2 = vsel %vm454_vm2, %v3750_v61, %v2620_v38  ;;  %v2622_v4 = vsel %vm454_vm2, %v3749_v63, %v3750_v61  ;;  %v2623_v7 = vsel %vm454_vm2, %v2620_v38, %v3749_v63 }
 0x9db   : > { %v3347_v8 = vpack.c.bf16 %v2623_v7, %v2623_v7  ;;  %v3753_v9 = vpop.permute.xlu0 %3752  ;;  %v3886_v15 = vpack.c.bf16 %v2621_v2, %v2621_v2  ;;  %v3887_v16 = vpack.c.bf16 %v2622_v4, %v2622_v4 }
 0x9dc   : > { %v3755_v10 = vunpack.i.h.bf16 %v3753_v9  ;;  %v3754_v11 = vunpack.i.l.bf16 %v3753_v9  ;;  %v2548_v14 = vpop.permute.xlu1 %2547 }
 0x9dd   : > { %2638 = vst [vmem:[#allocation3 + $0x68] sm:$0xf] %v3347_v8  ;;  %3244 = vmatprep.subr.msk.bf16.mxu0 %vm600_vm3, %v3886_v15  ;;  %v2730_v22 = vsel %vm600_vm3, %v3887_v16, 0 }
 0x9de   : > { %v2573_v17 = vsel %vm404_vm1, %v3755_v10, %v2572_v0  ;;  %v2574_v18 = vsel %vm404_vm1, %v3754_v11, %v3755_v10  ;;  %v2575_v19 = vsel %vm404_vm1, %v2572_v0, %v3754_v11  ;;  %2745 = vmatpush1.bf16.msra.mxu0 %v2730_v22 }
 0x9df   : > { %v3343_v20 = vpack.c.bf16 %v2575_v19, %v2575_v19  ;;  %v3758_v21 = vpop.permute.xlu0 %3757 }
 0x9e0   : > { %v3760_v23 = vunpack.i.h.bf16 %v3758_v21  ;;  %v3759_v24 = vunpack.i.l.bf16 %v3758_v21  ;;  %v2485_v29 = vpop.permute.xlu1 %2484 }
 0x9e1   : > { %2590 = vst [vmem:[#allocation3 + $0x50] sm:$0xf] %v3343_v20 }
 0x9e2   : > { %v2597_v25 = vsel %vm429_vm4, %v3760_v23, %v2596_v1  ;;  %v2598_v26 = vsel %vm429_vm4, %v3759_v24, %v3760_v23  ;;  %v2599_v27 = vsel %vm429_vm4, %v2596_v1, %v3759_v24 }
 0x9e3   : > { %v3345_v32 = vpack.c.bf16 %v2599_v27, %v2599_v27  ;;  %v3763_v33 = vpop.permute.xlu0 %3762  ;;  %v3888_v40 = vpack.c.bf16 %v2598_v26, %v2574_v18  ;;  %v3889_v41 = vpack.c.bf16 %v2597_v25, %v2573_v17 }
 0x9e4   : > { %v3765_v34 = vunpack.i.h.bf16 %v3763_v33  ;;  %v3764_v35 = vunpack.i.l.bf16 %v3763_v33  ;;  %v3808_v36 = vld [vmem:[#allocation3 + $0x68] ss:$0 sps:$4 sm:$0xff]   ;;  %v2509_v58 = vpop.permute.xlu1 %2508 }
 0x9e5   : > { %2614 = vst [vmem:[#allocation3 + $0x5c] sm:$0xf] %v3345_v32  ;;  %3512 = vmatprep.subr.msk.bf16.mxu1 %vm600_vm3, %v3808_v36  ;;  %v2736_v48 = vsel %vm600_vm3, %v3808_v36, 0  ;;  %2746 = vmatprep.subr.bf16.mxu0 %v3889_v41 }
 0x9e6   : > { %v2549_v45 = vsel %vm379_vm5, %v3765_v34, %v2548_v14  ;;  %v2550_v46 = vsel %vm379_vm5, %v3764_v35, %v3765_v34  ;;  %v2551_v47 = vsel %vm379_vm5, %v2548_v14, %v3764_v35  ;;  %3487 = vmatpush3.bf16.msra.mxu1 %v2736_v48  ;;  %2747 = vmatpush1.bf16.msra.mxu0 %v3888_v40 }
 0x9e7   : > { %v3341_v5 = vpack.c.bf16 %v2551_v47, %v2551_v47  ;;  %v3768_v28 = vpop.permute.xlu0 %3767  ;;  %v3890_v3 = vpack.c.bf16 %v2550_v46, %v4735_v60  ;;  %v3891_v53 = vpack.c.bf16 %v2549_v45, %v4741_v57 }
 0x9e8   : > { %v3770_v52 = vunpack.i.h.bf16 %v3768_v28  ;;  %v3769_v12 = vunpack.i.l.bf16 %v3768_v28  ;;  %v2437_v9 = vpop.permute.xlu1 %2436 }
 0x9e9   : > { %2566 = vst [vmem:[#allocation3 + $0x44] sm:$0xf] %v3341_v5  ;;  %2748 = vmatprep.subr.bf16.mxu0 %v3891_v53 }
 0x9ea   : > { %v2486_v62 = vsel %vm314_vm6, %v3770_v52, %v2485_v29  ;;  %v2487_v38 = vsel %vm314_vm6, %v3769_v12, %v3770_v52  ;;  %v2488_v0 = vsel %vm314_vm6, %v2485_v29, %v3769_v12  ;;  %2749 = vmatpush1.bf16.msra.mxu0 %v3890_v3 }
 0x9eb   : > { %v3335_v1 = vpack.c.bf16 %v2486_v62, %v2486_v62  ;;  %v3773_v54 = vpop.permute.xlu0 %3772 }
 0x9ec   : > { %v3775_v61 = vunpack.i.h.bf16 %v3773_v54  ;;  %v3774_v63 = vunpack.i.l.bf16 %v3773_v54  ;;  %v3809_v2 = vld [vmem:[#allocation3 + $0x50] ss:$12 sps:$4 sm:$0xff]   ;;  %v2461_v26 = vpop.permute.xlu1 %2460 }
 0x9ed   : > { %2503 = vst [vmem:[#allocation3 + $0x20] sm:$0xf] %v3335_v1  ;;  %3488 = vmatprep.subr.bf16.mxu1 %v3809_v2 }
 0x9ee   : > { %v2510_v4 = vsel %vm339_vm7, %v3775_v61, %v2509_v58  ;;  %v2511_v7 = vsel %vm339_vm7, %v3774_v63, %v3775_v61  ;;  %v2512_v8 = vsel %vm339_vm7, %v2509_v58, %v3774_v63  ;;  %3489 = vmatpush3.bf16.msra.mxu1 %v3809_v2 }
 0x9ef   : > { %v3337_v10 = vpack.c.bf16 %v2510_v4, %v2510_v4  ;;  %v3778_v11 = vpop.permute.xlu0 %3777  ;;  %v3892_v17 = vpack.c.bf16 %v2512_v8, %v2488_v0  ;;  %v3893_v18 = vpack.c.bf16 %v2511_v7, %v2487_v38 }
 0x9f0   : > { %v3780_v14 = vunpack.i.h.bf16 %v3778_v11  ;;  %v3779_v15 = vunpack.i.l.bf16 %v3778_v11  ;;  %v3810_v16 = vld [vmem:[#allocation3 + $0x38] ss:$12 sps:$4 sm:$0xff]  }
 0x9f1   : > { %2527 = vst [vmem:[#allocation3 + $0x2c] sm:$0xf] %v3337_v10  ;;  %3490 = vmatprep.subr.bf16.mxu1 %v3810_v16  ;;  %2750 = vmatprep.subr.bf16.mxu0 %v3893_v18 }
 0x9f2   : > { %v2438_v19 = vsel %vm264_vm8, %v3780_v14, %v2437_v9  ;;  %v2439_v20 = vsel %vm264_vm8, %v3779_v15, %v3780_v14  ;;  %v2440_v21 = vsel %vm264_vm8, %v2437_v9, %v3779_v15  ;;  %3491 = vmatpush3.bf16.msra.mxu1 %v3810_v16  ;;  %2751 = vmatpush1.bf16.msra.mxu0 %v3892_v17 }
 0x9f3   : > { %v3331_v22 = vpack.c.bf16 %v2438_v19, %v2438_v19  ;;  %v3783_v23 = vpop.permute.xlu0 %3782 }
 0x9f4   : > { %v3785_v24 = vunpack.i.h.bf16 %v3783_v23  ;;  %v3784_v25 = vunpack.i.l.bf16 %v3783_v23 }
 0x9f5   : > { %2455 = vst [vmem:[#allocation3 + $0x8] sm:$0xf] %v3331_v22 }
 0x9f6   : > { %v2462_v27 = vsel %vm289_vm9, %v3785_v24, %v2461_v26  ;;  %v2463_v29 = vsel %vm289_vm9, %v3784_v25, %v3785_v24  ;;  %v2464_v32 = vsel %vm289_vm9, %v2461_v26, %v3784_v25 }
 0x9f7   : > { %v3333_v33 = vpack.c.bf16 %v2462_v27, %v2462_v27  ;;  %v3894_v35 = vpack.c.bf16 %v2464_v32, %v2440_v21  ;;  %v3895_v36 = vpack.c.bf16 %v2463_v29, %v2439_v20 }
 0x9f8   : > { %v3811_v34 = vld [vmem:[#allocation3 + $0x20] ss:$12 sps:$4 sm:$0xff]  }
 0x9f9   : > { %2479 = vst [vmem:[#allocation3 + $0x14] sm:$0xf] %v3333_v33  ;;  %3492 = vmatprep.subr.bf16.mxu1 %v3811_v34  ;;  %2752 = vmatprep.subr.bf16.mxu0 %v3895_v36 }
 0x9fa   : > { %3493 = vmatpush3.bf16.msra.mxu1 %v3811_v34  ;;  %2753 = vmatpush1.bf16.msra.mxu0 %v3894_v35 }
 0x9fb   : > { %3500 = vmatprep.subr.bf16.mxu0 %v4008_v39 }
 0x9fd   : > { %3245 = vmatmul.mubr.msk.bf16.vlgmr.msra.gmra.mxu0 %vm593_vm0, %v4544_v43 }
 0x9fe   : > { %2780 = vmatprep.mubr.bf16.mxu0 %v4006_v6 }
 0xa00   : > { %v3812_v40 = vld [vmem:[#allocation3 + $0x8] ss:$12 sps:$4 sm:$0xff]  }
 0xa01   : > { %3494 = vmatprep.subr.bf16.mxu1 %v3812_v40 }
 0xa02   : > { %3495 = vmatpush3.bf16.msra.mxu1 %v3812_v40 }
 0xa05   : > { %3497 = vmatmul.mubr.msk.bf16.vlgmr.msra.gmra.mxu1 %vm593_vm0, %v4686_v37  ;;  %3246 = vmatmul.mubr.msk.bf16.gmra.mxu0 %vm593_vm0, %v4686_v37 }
 0xa06   : > { %2890 = vmatprep.mubr.bf16.mxu1 %v4006_v6  ;;  %3504 = vmatprep.mubr.msk.bf16.mxu0 %vm4009_vm10, %v4008_v39 }
 0xabd   : > { %v2772_v13 = vpop.f32.mrf.mxu0 }
 0xabe   : > { %v2773_v14 = vadd.f32 %v2772_v13, %v4263_v49 }
 0xabf   : > { %v2774_v41 = vpop.f32.mrf.mxu0 }
 0xac0   : > { %v2775_v63 = vadd.f32 %v2774_v41, %v4263_v49 }
 0xac1   : > { %v2776_v45 = vpop.f32.mrf.mxu0 }
 0xac2   : > { %v2777_v4 = vadd.f32 %v2776_v45, %v4266_v55  ;;  %v2841_v17 = vmax.f32 %v2775_v63, 0.0 }
 0xac3   : > { %v2778_v43 = vpop.f32.mrf.mxu0 }
 0xac4   : > { %v2779_v37 = vadd.f32 %v2778_v43, %v4266_v55  ;;  %v2843_v19 = vmax.f32 %v2777_v4, 0.0 }
 0xac5   : > { %v3498_v46 = vpop.f32.mrf.mxu1  ;;  %v2782_v47 = vpop.f32.mrf.mxu0 }
 0xac6   : > { %v2834_v5 = vadd.f32 %v3498_v46, %v4260_v44  ;;  %v2783_v3 = vadd.f32 %v2782_v47, %v4260_v44  ;;  %v2844_v10 = vmax.f32 %v2779_v37, 0.0 }
 0xac7   : > { %v2825_v48 = vpop.f32.mrf.mxu1  ;;  %v2784_v28 = vpop.f32.mrf.mxu0 }
 0xac8   : > { %v2785_v53 = vadd.f32 %v2784_v28, %v4260_v44  ;;  %v2848_v38 = vmax.f32 %v2834_v5, 0.0  ;;  %v2826_v0 = vadd.f32 %v2825_v48, %v4263_v49  ;;  %v2846_v16 = vmax.f32 %v2783_v3, 0.0 }
 0xac9   : > { %v3499_v52 = vpop.f32.mrf.mxu1  ;;  %v2786_v58 = vpop.f32.mrf.mxu0  ;;  %v2853_v21 = vpack.c.bf16 %v2844_v10, %v2841_v17 }
 0xaca   : > { %v2837_v12 = vadd.f32 %v3499_v52, %v4258_v42  ;;  %v2787_v62 = vadd.f32 %v2786_v58, %v4258_v42  ;;  %v2847_v44 = vmax.f32 %v2785_v53, 0.0  ;;  %v2842_v15 = vmax.f32 %v2826_v0, 0.0 }
 0xacb   : > { %v2828_v6 = vpop.f32.mrf.mxu1  ;;  %v2788_v61 = vpop.f32.mrf.mxu0 }
 0xacc   : > { %v2851_v1 = vmax.f32 %v2837_v12, 0.0  ;;  %v2829_v54 = vadd.f32 %v2828_v6, %v4266_v55  ;;  %v2789_v2 = vadd.f32 %v2788_v61, %v4258_v42  ;;  %v2849_v9 = vmax.f32 %v2787_v62, 0.0 }
 0xacd   : > { %v2840_v55 = vmax.f32 %v2773_v14, 0.0 }
 0xace   : > { %v2857_v7 = vpack.c.bf16 %v2851_v1, %v2848_v38  ;;  %v2845_v8 = vmax.f32 %v2829_v54, 0.0  ;;  %v2850_v11 = vmax.f32 %v2789_v2, 0.0  ;;  %v2855_v42 = vpack.c.bf16 %v2849_v9, %v2846_v16 }
 0xacf   : > { %v2852_v22 = vpack.c.bf16 %v2843_v19, %v2840_v55 }
 0xad0   : > { %3501 = vmatpush3.bf16.msra.mxu0 %v2857_v7  ;;  %v2856_v18 = vpack.c.bf16 %v2850_v11, %v2847_v44  ;;  %v2854_v20 = vpack.c.bf16 %v2845_v8, %v2842_v15 }
 0xad1   : > { %3502 = vmatprep.subr.bf16.mxu0 %v4008_v39 }
 0xad2   : > { %2870 = vmatprep.subr.bf16.mxu1 %v2856_v18 }
 0xad3   : > { %2871 = vmatpush1.bf16.msra.mxu1 %v2855_v42 }
 0xad4   : > { %3503 = vmatpush3.bf16.msra.mxu0 %v2854_v20  ;;  %2872 = vmatprep.subr.bf16.mxu1 %v2853_v21 }
 0xad7   : > { %3505 = vmatmul.mubr.msk.bf16.vlgmr.msra.gmra.mxu0 %vm735_vm11, %v4711_v31  ;;  %2873 = vmatpush1.bf16.msra.mxu1 %v2852_v22 }
 0xada   : > { %3249 = vmatmul.mubr.msk.bf16.vlgmr.msra.gmra.mxu1 %vm735_vm11, %v4711_v31 }
 0xb97   : > { %v2933_v49 = vpop.f32.mrf.mxu0 }
 0xb98   : > { %v2934_v39 = vadd.f32 %v2933_v49, %v4291_v30 }
 0xb99   : > { %v3506_v23 = vpop.f32.mrf.mxu0 }
 0xb9a   : > { %3837 = vtanh.f32 %v2934_v39  ;;  %v2892_v24 = vpop.f32.mrf.mxu1 }
 0xb9b   : > { %v2936_v25 = vpop.f32.mrf.mxu0  ;;  %v2893_v26 = vadd.f32 %v2892_v24, %v4291_v30 }
 0xb9c   : > { %v2894_v27 = vpop.f32.mrf.mxu1 }
 0xb9d   : > { %v3507_v29 = vpop.f32.mrf.mxu0  ;;  %3839 = vtanh.f32 %v2893_v26  ;;  %v2895_v32 = vadd.f32 %v2894_v27, %v4291_v30 }
 0xb9e   : > { %v2896_v33 = vpop.f32.mrf.mxu1 }
 0xb9f   : > { %3841 = vtanh.f32 %v2895_v32 }
 0xba0   : > { %v2897_v31 = vpop.f32.mrf.mxu1 }
 0xba7   : > { %v3838_v34 = vpop.eup %3837 }
 0xba8   : > { %v2944_v35 = vadd.f32 %v3838_v34, %v4725_v51 }
 0xbaa   : > { %v2947_v36 = vmul.f32 %v2944_v35, %v4300_v50  ;;  %v3840_v40 = vpop.eup %3839 }
 0xbab   : > { %v2942_v13 = vadd.f32 %v3840_v40, %v4735_v60 }
 0xbac   : > { %2950 = vst [vmem:[#allocation2 + $0x10] sm:$0xff] %v2947_v36  ;;  %3253 = vst [vmem:[%s4106_s13 + $0x70] sm:$0xff] %v2947_v36  ;;  %v3842_v30 = vpop.eup %3841 }
 0xbad   : > { %v2945_v41 = vmul.f32 %v2942_v13, %v4306_v56  ;;  %v2943_v45 = vadd.f32 %v3842_v30, %v4741_v57 }
 0xbaf   : > { %2948 = vst [vmem:[#allocation2] sm:$0xff] %v2945_v41  ;;  %3251 = vst [vmem:[%s4106_s13 + $0x60] sm:$0xff] %v2945_v41  ;;  %v2946_v50 = vmul.f32 %v2943_v45, %v4311_v59 }
 0xbb1   : > { %2949 = vst [vmem:[#allocation2 + $0x8] sm:$0xff] %v2946_v50  ;;  %3252 = vst [vmem:[%s4106_s13 + $0x68] sm:$0xff] %v2946_v50 }
 0xbb2   : > { %3931 = shalt.err (!%p3928_p1)
}
 0xbb3   : > { %s3932_s13 = scalar_lea.hbm %s4865_s8, 1920  ;;  %s3936_s28 = scalar_lea.hbm %s4925_s6, 3840 }
 0xbb4   : > { %p3933_p2 = scmp.ne.s32.totalorder %s4865_s8, %s3932_s13  ;;  %p3937_p6 = scmp.lt.s32.totalorder %s4865_s8, %s4925_s6 }
 0xbb5   : > { %p3938_p7 = scmp.lt.s32.totalorder %s3936_s28, %s3932_s13 }
 0xbb6   : > { %p3934_p3 = pnand %p3933_p2, %p4088_p4 }
 0xbb7   : > { %p3939_p9 = por %p3938_p7, %p3937_p6 }
 0xbb8   : > { %p3935_p5 = pneg %p3934_p3 }
 0xbba   : > { %p3940_p10 = pnand %p3939_p9, %p3935_p5 }
 0xbbc   : > { %3943 = shalt.err (!%p3940_p10)
}
 0xbbd   : > { %s4011_s15 = smov 384   ;;  %s4012_s16 = smov 24  }
 0xbbe   : > { %3515 = dma.vmem_to_hbm [thread:$0]  (%p4088_p4), %s4867_s14, 1920, %s4865_s8, %s4874_s12, %s4011_s15, %s4011_s15, %s4012_s16  }
 0xbbf PF: > { %p3521_p11 = scmp.ge.s32.totalorder %s3996_s26, 2  ;;  %s2987_s24 = sand.u32 1, %s3976_s21  }
 0xbc0   : > { %s2988_s20 = scalar_lea.sflag [#allocation5], %s2987_s24 }
 0xbc1   : > { %p3518_p12 = pnand %p3521_p11, %p4095_p8 }
 0xbc3   : > { %p3519_p13 = pneg %p3518_p12 }
 0xbc5   : > { %3971 = dma.done.wait (%p3519_p13), %s2988_s20, 1920  }
 0xbc6   : > { %3973 = vsyncadd (%p3519_p13), %s2988_s20, 4294965376  ;;  %s19_s26 = sadd.s32 1, %s3996_s26   ;;  %s4944_s7 = sld [smem:[#allocation13_spill]] }
 0xbc7   : > { %p16_p0 = scmp.ge.s32.totalorder %s19_s26, 4   ;;  %s4945_s21 = smov %s3980_s22 }
 0xbc8   : > { %s4946_s22 = smov %s3984_s23  ;;  %s4947_s23 = smov %s4101_s10 }
 0xbc9   : > { %s4948_s24 = smov %s3992_s25  ;;  %18 = sbr.rel (!%p16_p0) target bundleno = 4 (0x4), region = 86 }
 0xbcc   : > { %s4949_s25 = smov %s4944_s7 }
 0xbce   :  { %2993 = vsyncpa [#allocation5], 1 }
 0xbcf   :  { %2995 = vsyncpa [#allocation5 + $0x1], 1 }

</bundles_post_ra>
